<compile_context>
chip_gen: v6e
topology: v6e:2x2x1
jax: 0.10.0
libtpu: 0.0.40
codegen_flags: <defaults>
</compile_context>

<pallas_src>
import functools

import jax
import jax.numpy as jnp
from jax.experimental import pallas as pl
from jax.experimental.pallas import tpu as pltpu

HIDDEN = 128          # GRU input_size == hidden_size == 128 (fixed by the module)
LEAKY_SLOPE = 0.01    # F.leaky_relu default negative_slope
_MAX_TIME_CHUNK = 32  # timesteps per grid step (kept small so 2 pipeline buffers stay tiny)


def _pick_time_chunk(T, max_chunk=_MAX_TIME_CHUNK):
    for tt in range(min(T, max_chunk), 0, -1):
        if T % tt == 0:
            return tt
    return 1


def _gru_seq_kernel(gi_ref, whh_ref, bhhn_ref, hs_ref, h_ref):
    """One grid step == TT timesteps of the GRU recurrence.

    gi_ref  : (TT, B, 3H)  precomputed x@W_ih^T + b_ih (+ b_hh folded in for r,z gates), f32
    whh_ref : (H, 3H)      W_hh^T (f32 or bf16 depending on matmul_dtype)
    bhhn_ref: (1, H)       b_hh for the n gate (must stay inside r*(.))
    hs_ref  : (TT, B, H)   output hidden states (lane-dense last dim = 128)
    h_ref   : (B, H)       persistent hidden-state VMEM scratch (f32), carried across chunks
    """
    c = pl.program_id(0)
    H = HIDDEN

    @pl.when(c == 0)
    def _():
        h_ref[...] = jnp.zeros_like(h_ref)

    whh = whh_ref[...]        # hoisted: loaded once per chunk, not per timestep
    bhh_n = bhhn_ref[...]
    tt_chunk = gi_ref.shape[0]

    def step(tt, h_prev):
        gi = gi_ref[tt]                                           # (B, 3H) f32
        gh = jnp.dot(h_prev.astype(whh.dtype), whh,
                     preferred_element_type=jnp.float32)          # (B, 3H) f32
        r = jax.nn.sigmoid(gi[:, 0:H] + gh[:, 0:H])
        z = jax.nn.sigmoid(gi[:, H:2 * H] + gh[:, H:2 * H])
        n = jnp.tanh(gi[:, 2 * H:] + r * (gh[:, 2 * H:] + bhh_n))
        h_new = (1.0 - z) * n + z * h_prev
        hs_ref[tt] = h_new
        return h_new

    # Unrolled inner time loop: gives the LLO scheduler visibility across timesteps.
    h_ref[...] = jax.lax.fori_loop(0, tt_chunk, step, h_ref[...], unroll=True)


@functools.partial(jax.jit, static_argnames=("n_classes", "matmul_dtype"))
def pres_pred_rnn_forward(x_btd, params, n_classes, matmul_dtype=jnp.float32):
    """x_btd: (B, T, 128) float32, batch_first (PyTorch convention).
    Returns (B, T, n_classes) float32."""
    B, T, D = x_btd.shape
    assert D == HIDDEN
    H = HIDDEN

    wih = params["weight_ih"]          # (3H, H), gate order [r, z, n] (PyTorch)
    whh = params["weight_hh"]          # (3H, H)
    bih = params["bias_ih"]            # (3H,)
    bhh = params["bias_hh"]            # (3H,)
    wfc = params["fc_weight"]          # (nC, H)
    bfc = params["fc_bias"]            # (nC,)

    # Fold b_ih (all gates) and b_hh (r,z gates) into the precomputed input projection.
    # b_hh for the n gate stays separate: it must sit inside r * (W_hn h + b_hn).
    bias_gi = bih.at[: 2 * H].add(bhh[: 2 * H])            # (3H,)
    bhh_n = bhh[2 * H:].reshape(1, H)                      # (1, H)

    # Bulk input projection for ALL timesteps at once (M = T*B MXU rows instead of M = B
    # per step). Emitted directly time-major; XLA folds the transpose into the dot, so no
    # extra HBM pass over the activations.
    gi_tbg = jnp.einsum(
        "btd,gd->tbg",
        x_btd.astype(matmul_dtype), wih.astype(matmul_dtype),
        preferred_element_type=jnp.float32,
    ) + bias_gi                                            # (T, B, 3H) f32

    whh_t = whh.T.astype(matmul_dtype)                     # (H, 3H)
    tt = _pick_time_chunk(T)

    hs_tbd = pl.pallas_call(
        _gru_seq_kernel,
        out_shape=jax.ShapeDtypeStruct((T, B, H), jnp.float32),
        grid_spec=pltpu.PrefetchScalarGridSpec(
            num_scalar_prefetch=0,
            grid=(T // tt,),
            in_specs=[
                pl.BlockSpec((tt, B, 3 * H), lambda c: (c, 0, 0)),   # streamed gi chunk
                pl.BlockSpec((H, 3 * H), lambda c: (0, 0)),          # W_hh^T (resident)
                pl.BlockSpec((1, H), lambda c: (0, 0)),              # b_hh_n (resident)
            ],
            out_specs=pl.BlockSpec((tt, B, H), lambda c: (c, 0, 0)),  # streamed hs chunk
            scratch_shapes=[pltpu.VMEM((B, H), jnp.float32)],         # persistent h state
        ),
        compiler_params=pltpu.CompilerParams(
            dimension_semantics=("arbitrary",),   # sequential recurrence over time chunks
        ),
    )(gi_tbg, whh_t, bhh_n)

    # Bulk LeakyReLU + FC head over all timesteps: one (T*B, H) x (H, nC) matmul instead
    # of T tiny lane-sparse matmuls/stores; transpose back to batch-first folded into the dot.
    act = jnp.where(hs_tbd >= 0, hs_tbd, LEAKY_SLOPE * hs_tbd)
    out_btc = jnp.einsum(
        "tbh,ch->btc",
        act.astype(matmul_dtype), wfc.astype(matmul_dtype),
        preferred_element_type=jnp.float32,
    ) + bfc
    return out_btc


def _reference_forward(x_btd, params):
    """Pure-JAX reference matching torch.nn.GRU + LeakyReLU + Linear."""
    wih, whh = params["weight_ih"], params["weight_hh"]
    bih, bhh = params["bias_ih"], params["bias_hh"]
    wfc, bfc = params["fc_weight"], params["fc_bias"]
    H = HIDDEN

    def step(h, x_t):
        gi = x_t @ wih.T + bih
        gh = h @ whh.T + bhh
        r = jax.nn.sigmoid(gi[:, :H] + gh[:, :H])
        z = jax.nn.sigmoid(gi[:, H:2 * H] + gh[:, H:2 * H])
        n = jnp.tanh(gi[:, 2 * H:] + r * gh[:, 2 * H:])
        h_new = (1.0 - z) * n + z * h
        return h_new, h_new

    B = x_btd.shape[0]
    h0 = jnp.zeros((B, H), jnp.float32)
    _, hs = jax.lax.scan(step, h0, jnp.transpose(x_btd, (1, 0, 2)))  # (T, B, H)
    act = jnp.where(hs >= 0, hs, LEAKY_SLOPE * hs)
    out = act @ wfc.T + bfc
    return jnp.transpose(out, (1, 0, 2))


def make_params(key, n_classes):
    """Deterministic synthetic parameters with PyTorch-like uniform(-1/sqrt(H), 1/sqrt(H)) init."""
    k = 1.0 / jnp.sqrt(jnp.float32(HIDDEN))
    keys = jax.random.split(key, 6)
    u = lambda kk, shape: jax.random.uniform(kk, shape, jnp.float32, -k, k)
    return {
        "weight_ih": u(keys[0], (3 * HIDDEN, HIDDEN)),   # [r, z, n] stacked, PyTorch order
        "weight_hh": u(keys[1], (3 * HIDDEN, HIDDEN)),
        "bias_ih": u(keys[2], (3 * HIDDEN,)),
        "bias_hh": u(keys[3], (3 * HIDDEN,)),
        "fc_weight": u(keys[4], (n_classes, HIDDEN)),
        "fc_bias": u(keys[5], (n_classes,)),
    }


if __name__ == "__main__":
    import numpy as np

    B, T, N_CLASSES = 2, 8, 8
    key = jax.random.PRNGKey(0)
    kx, kp = jax.random.split(key)

    x = jax.random.normal(kx, (B, T, HIDDEN), jnp.float32)  # (batch, seq, 128), batch_first
    params = make_params(kp, N_CLASSES)

    ref = _reference_forward(x, params)

    # f32 path (works on all generations; v5e keeps everything f32).
    out = jax.block_until_ready(pres_pred_rnn_forward(x, params, N_CLASSES))
    assert out.shape == (B, T, N_CLASSES)
    np.testing.assert_allclose(np.asarray(out), np.asarray(ref), rtol=2e-5, atol=2e-5)

    # bf16 MXU-operand fast path (v6e/v7x); gate math and h update stay f32.
    out_bf16 = jax.block_until_ready(
        pres_pred_rnn_forward(x, params, N_CLASSES, matmul_dtype=jnp.bfloat16))
    np.testing.assert_allclose(np.asarray(out_bf16), np.asarray(ref), rtol=5e-2, atol=5e-2)

    print("KERNEL_OK")
</pallas_src>

<mosaic_0001>
module attributes {stable_mosaic.version = 11 : i64} {
  func.func @_gru_seq_kernel(%arg0: i32, %arg1: memref<8x2x384xf32, #tpu.memory_space<vmem>>, %arg2: memref<128x384xf32, #tpu.memory_space<vmem>>, %arg3: memref<1x128xf32, #tpu.memory_space<vmem>>, %arg4: memref<8x2x128xf32, #tpu.memory_space<vmem>>, %arg5: memref<2x128xf32, #tpu.memory_space<vmem>>) attributes {dimension_semantics = [#tpu.dimension_semantics<arbitrary>], iteration_bounds = array<i64: 1>, scalar_prefetch = 0 : i64, scratch_operands = 1 : i64, tpu.core_type = #tpu.core_type<tc>, window_params = [{transform_indices = @transform_0, window_bounds = array<i64: 8, 2, 384>}, {pipeline_mode = #tpu.pipeline_mode<synchronous>, transform_indices = @transform_1, window_bounds = array<i64: 128, 384>}, {pipeline_mode = #tpu.pipeline_mode<synchronous>, transform_indices = @transform_2, window_bounds = array<i64: 1, 128>}, {transform_indices = @transform_3, window_bounds = array<i64: 8, 2, 128>}]} {
    %c0_i32 = arith.constant 0 : i32
    %0 = arith.cmpi eq, %arg0, %c0_i32 : i32
    %1 = arith.extui %0 : i1 to i32
    %c0_i32_0 = arith.constant 0 : i32
    %2 = arith.cmpi ne, %1, %c0_i32_0 : i32
    scf.if %2 {
      %cst_72 = arith.constant 0.000000e+00 : f32
      %295 = vector.broadcast %cst_72 : f32 to vector<2x128xf32>
      %c0_73 = arith.constant 0 : index
      %c0_74 = arith.constant 0 : index
      %296 = vector.load %arg5[%c0_73, %c0_74] : memref<2x128xf32, #tpu.memory_space<vmem>>, vector<2x128xf32>
      tpu.vector_store %arg5[%c0_73, %c0_74], %295 {strides = array<i32>} : memref<2x128xf32, #tpu.memory_space<vmem>>, vector<2x128xf32>,
    } else {
    }
    %c0 = arith.constant 0 : index
    %c0_1 = arith.constant 0 : index
    %3 = vector.load %arg2[%c0, %c0_1] : memref<128x384xf32, #tpu.memory_space<vmem>>, vector<128x384xf32>
    %c0_2 = arith.constant 0 : index
    %c0_3 = arith.constant 0 : index
    %4 = vector.load %arg3[%c0_2, %c0_3] : memref<1x128xf32, #tpu.memory_space<vmem>>, vector<1x128xf32>
    %c0_4 = arith.constant 0 : index
    %c0_5 = arith.constant 0 : index
    %5 = vector.load %arg5[%c0_4, %c0_5] : memref<2x128xf32, #tpu.memory_space<vmem>>, vector<2x128xf32>
    %c0_i32_6 = arith.constant 0 : i32
    %6 = arith.index_cast %c0_i32_6 : i32 to index
    %c0_7 = arith.constant 0 : index
    %c0_8 = arith.constant 0 : index
    %7 = vector.load %arg1[%6, %c0_7, %c0_8] : memref<8x2x384xf32, #tpu.memory_space<vmem>>, vector<1x2x384xf32>
    %8 = vector.shape_cast %7 : vector<1x2x384xf32> to vector<2x384xf32>
    %cst = arith.constant dense<0.000000e+00> : vector<2x384xf32>
    %9 = tpu.matmul %5, %3, %cst {dimension_numbers = #tpu.dot_dimension_numbers<[1], [0], [0], [1], [0, 0, 1, 1], [], []>} : vector<2x128xf32>, vector<128x384xf32>, vector<2x384xf32> -> vector<2x384xf32>
    %10 = vector.extract_strided_slice %8 {offsets = [0, 0], sizes = [2, 128], strides = [1, 1]} : vector<2x384xf32> to vector<2x128xf32>
    %11 = vector.extract_strided_slice %9 {offsets = [0, 0], sizes = [2, 128], strides = [1, 1]} : vector<2x384xf32> to vector<2x128xf32>
    %12 = arith.addf %10, %11 : vector<2x128xf32>
    %13 = arith.negf %12 : vector<2x128xf32>
    %14 = math.exp %13 : vector<2x128xf32>
    %cst_9 = arith.constant 1.000000e+00 : f32
    %15 = vector.broadcast %cst_9 : f32 to vector<2x128xf32>
    %16 = arith.addf %15, %14 : vector<2x128xf32>
    %17 = arith.divf %15, %16 : vector<2x128xf32>
    %18 = vector.extract_strided_slice %8 {offsets = [0, 128], sizes = [2, 128], strides = [1, 1]} : vector<2x384xf32> to vector<2x128xf32>
    %19 = vector.extract_strided_slice %9 {offsets = [0, 128], sizes = [2, 128], strides = [1, 1]} : vector<2x384xf32> to vector<2x128xf32>
    %20 = arith.addf %18, %19 : vector<2x128xf32>
    %21 = arith.negf %20 : vector<2x128xf32>
    %22 = math.exp %21 : vector<2x128xf32>
    %cst_10 = arith.constant 1.000000e+00 : f32
    %23 = vector.broadcast %cst_10 : f32 to vector<2x128xf32>
    %24 = arith.addf %23, %22 : vector<2x128xf32>
    %25 = arith.divf %23, %24 : vector<2x128xf32>
    %26 = vector.extract_strided_slice %8 {offsets = [0, 256], sizes = [2, 128], strides = [1, 1]} : vector<2x384xf32> to vector<2x128xf32>
    %27 = vector.extract_strided_slice %9 {offsets = [0, 256], sizes = [2, 128], strides = [1, 1]} : vector<2x384xf32> to vector<2x128xf32>
    %28 = vector.broadcast %4 : vector<1x128xf32> to vector<2x128xf32>
    %29 = arith.addf %27, %28 : vector<2x128xf32>
    %30 = arith.mulf %17, %29 : vector<2x128xf32>
    %31 = arith.addf %26, %30 : vector<2x128xf32>
    %32 = math.tanh %31 : vector<2x128xf32>
    %cst_11 = arith.constant 1.000000e+00 : f32
    %33 = vector.broadcast %cst_11 : f32 to vector<2x128xf32>
    %34 = arith.subf %33, %25 : vector<2x128xf32>
    %35 = arith.mulf %34, %32 : vector<2x128xf32>
    %36 = arith.mulf %25, %5 : vector<2x128xf32>
    %37 = arith.addf %35, %36 : vector<2x128xf32>
    %38 = arith.index_cast %c0_i32_6 : i32 to index
    %c0_12 = arith.constant 0 : index
    %c0_13 = arith.constant 0 : index
    %39 = vector.load %arg4[%38, %c0_12, %c0_13] : memref<8x2x128xf32, #tpu.memory_space<vmem>>, vector<1x2x128xf32>
    %40 = vector.shape_cast %39 : vector<1x2x128xf32> to vector<2x128xf32>
    %41 = vector.shape_cast %37 : vector<2x128xf32> to vector<1x2x128xf32>
    tpu.vector_store %arg4[%38, %c0_12, %c0_13], %41 {strides = array<i32>} : memref<8x2x128xf32, #tpu.memory_space<vmem>>, vector<1x2x128xf32>,
    %c1_i32 = arith.constant 1 : i32
    %42 = arith.index_cast %c1_i32 : i32 to index
    %c0_14 = arith.constant 0 : index
    %c0_15 = arith.constant 0 : index
    %43 = vector.load %arg1[%42, %c0_14, %c0_15] : memref<8x2x384xf32, #tpu.memory_space<vmem>>, vector<1x2x384xf32>
    %44 = vector.shape_cast %43 : vector<1x2x384xf32> to vector<2x384xf32>
    %cst_16 = arith.constant dense<0.000000e+00> : vector<2x384xf32>
    %45 = tpu.matmul %37, %3, %cst_16 {dimension_numbers = #tpu.dot_dimension_numbers<[1], [0], [0], [1], [0, 0, 1, 1], [], []>} : vector<2x128xf32>, vector<128x384xf32>, vector<2x384xf32> -> vector<2x384xf32>
    %46 = vector.extract_strided_slice %44 {offsets = [0, 0], sizes = [2, 128], strides = [1, 1]} : vector<2x384xf32> to vector<2x128xf32>
    %47 = vector.extract_strided_slice %45 {offsets = [0, 0], sizes = [2, 128], strides = [1, 1]} : vector<2x384xf32> to vector<2x128xf32>
    %48 = arith.addf %46, %47 : vector<2x128xf32>
    %49 = arith.negf %48 : vector<2x128xf32>
    %50 = math.exp %49 : vector<2x128xf32>
    %cst_17 = arith.constant 1.000000e+00 : f32
    %51 = vector.broadcast %cst_17 : f32 to vector<2x128xf32>
    %52 = arith.addf %51, %50 : vector<2x128xf32>
    %53 = arith.divf %51, %52 : vector<2x128xf32>
    %54 = vector.extract_strided_slice %44 {offsets = [0, 128], sizes = [2, 128], strides = [1, 1]} : vector<2x384xf32> to vector<2x128xf32>
    %55 = vector.extract_strided_slice %45 {offsets = [0, 128], sizes = [2, 128], strides = [1, 1]} : vector<2x384xf32> to vector<2x128xf32>
    %56 = arith.addf %54, %55 : vector<2x128xf32>
    %57 = arith.negf %56 : vector<2x128xf32>
    %58 = math.exp %57 : vector<2x128xf32>
    %cst_18 = arith.constant 1.000000e+00 : f32
    %59 = vector.broadcast %cst_18 : f32 to vector<2x128xf32>
    %60 = arith.addf %59, %58 : vector<2x128xf32>
    %61 = arith.divf %59, %60 : vector<2x128xf32>
    %62 = vector.extract_strided_slice %44 {offsets = [0, 256], sizes = [2, 128], strides = [1, 1]} : vector<2x384xf32> to vector<2x128xf32>
    %63 = vector.extract_strided_slice %45 {offsets = [0, 256], sizes = [2, 128], strides = [1, 1]} : vector<2x384xf32> to vector<2x128xf32>
    %64 = vector.broadcast %4 : vector<1x128xf32> to vector<2x128xf32>
    %65 = arith.addf %63, %64 : vector<2x128xf32>
    %66 = arith.mulf %53, %65 : vector<2x128xf32>
    %67 = arith.addf %62, %66 : vector<2x128xf32>
    %68 = math.tanh %67 : vector<2x128xf32>
    %cst_19 = arith.constant 1.000000e+00 : f32
    %69 = vector.broadcast %cst_19 : f32 to vector<2x128xf32>
    %70 = arith.subf %69, %61 : vector<2x128xf32>
    %71 = arith.mulf %70, %68 : vector<2x128xf32>
    %72 = arith.mulf %61, %37 : vector<2x128xf32>
    %73 = arith.addf %71, %72 : vector<2x128xf32>
    %74 = arith.index_cast %c1_i32 : i32 to index
    %c0_20 = arith.constant 0 : index
    %c0_21 = arith.constant 0 : index
    %75 = vector.load %arg4[%74, %c0_20, %c0_21] : memref<8x2x128xf32, #tpu.memory_space<vmem>>, vector<1x2x128xf32>
    %76 = vector.shape_cast %75 : vector<1x2x128xf32> to vector<2x128xf32>
    %77 = vector.shape_cast %73 : vector<2x128xf32> to vector<1x2x128xf32>
    tpu.vector_store %arg4[%74, %c0_20, %c0_21], %77 {strides = array<i32>} : memref<8x2x128xf32, #tpu.memory_space<vmem>>, vector<1x2x128xf32>,
    %c2_i32 = arith.constant 2 : i32
    %78 = arith.index_cast %c2_i32 : i32 to index
    %c0_22 = arith.constant 0 : index
    %c0_23 = arith.constant 0 : index
    %79 = vector.load %arg1[%78, %c0_22, %c0_23] : memref<8x2x384xf32, #tpu.memory_space<vmem>>, vector<1x2x384xf32>
    %80 = vector.shape_cast %79 : vector<1x2x384xf32> to vector<2x384xf32>
    %cst_24 = arith.constant dense<0.000000e+00> : vector<2x384xf32>
    %81 = tpu.matmul %73, %3, %cst_24 {dimension_numbers = #tpu.dot_dimension_numbers<[1], [0], [0], [1], [0, 0, 1, 1], [], []>} : vector<2x128xf32>, vector<128x384xf32>, vector<2x384xf32> -> vector<2x384xf32>
    %82 = vector.extract_strided_slice %80 {offsets = [0, 0], sizes = [2, 128], strides = [1, 1]} : vector<2x384xf32> to vector<2x128xf32>
    %83 = vector.extract_strided_slice %81 {offsets = [0, 0], sizes = [2, 128], strides = [1, 1]} : vector<2x384xf32> to vector<2x128xf32>
    %84 = arith.addf %82, %83 : vector<2x128xf32>
    %85 = arith.negf %84 : vector<2x128xf32>
    %86 = math.exp %85 : vector<2x128xf32>
    %cst_25 = arith.constant 1.000000e+00 : f32
    %87 = vector.broadcast %cst_25 : f32 to vector<2x128xf32>
    %88 = arith.addf %87, %86 : vector<2x128xf32>
    %89 = arith.divf %87, %88 : vector<2x128xf32>
    %90 = vector.extract_strided_slice %80 {offsets = [0, 128], sizes = [2, 128], strides = [1, 1]} : vector<2x384xf32> to vector<2x128xf32>
    %91 = vector.extract_strided_slice %81 {offsets = [0, 128], sizes = [2, 128], strides = [1, 1]} : vector<2x384xf32> to vector<2x128xf32>
    %92 = arith.addf %90, %91 : vector<2x128xf32>
    %93 = arith.negf %92 : vector<2x128xf32>
    %94 = math.exp %93 : vector<2x128xf32>
    %cst_26 = arith.constant 1.000000e+00 : f32
    %95 = vector.broadcast %cst_26 : f32 to vector<2x128xf32>
    %96 = arith.addf %95, %94 : vector<2x128xf32>
    %97 = arith.divf %95, %96 : vector<2x128xf32>
    %98 = vector.extract_strided_slice %80 {offsets = [0, 256], sizes = [2, 128], strides = [1, 1]} : vector<2x384xf32> to vector<2x128xf32>
    %99 = vector.extract_strided_slice %81 {offsets = [0, 256], sizes = [2, 128], strides = [1, 1]} : vector<2x384xf32> to vector<2x128xf32>
    %100 = vector.broadcast %4 : vector<1x128xf32> to vector<2x128xf32>
    %101 = arith.addf %99, %100 : vector<2x128xf32>
    %102 = arith.mulf %89, %101 : vector<2x128xf32>
    %103 = arith.addf %98, %102 : vector<2x128xf32>
    %104 = math.tanh %103 : vector<2x128xf32>
    %cst_27 = arith.constant 1.000000e+00 : f32
    %105 = vector.broadcast %cst_27 : f32 to vector<2x128xf32>
    %106 = arith.subf %105, %97 : vector<2x128xf32>
    %107 = arith.mulf %106, %104 : vector<2x128xf32>
    %108 = arith.mulf %97, %73 : vector<2x128xf32>
    %109 = arith.addf %107, %108 : vector<2x128xf32>
    %110 = arith.index_cast %c2_i32 : i32 to index
    %c0_28 = arith.constant 0 : index
    %c0_29 = arith.constant 0 : index
    %111 = vector.load %arg4[%110, %c0_28, %c0_29] : memref<8x2x128xf32, #tpu.memory_space<vmem>>, vector<1x2x128xf32>
    %112 = vector.shape_cast %111 : vector<1x2x128xf32> to vector<2x128xf32>
    %113 = vector.shape_cast %109 : vector<2x128xf32> to vector<1x2x128xf32>
    tpu.vector_store %arg4[%110, %c0_28, %c0_29], %113 {strides = array<i32>} : memref<8x2x128xf32, #tpu.memory_space<vmem>>, vector<1x2x128xf32>,
    %c3_i32 = arith.constant 3 : i32
    %114 = arith.index_cast %c3_i32 : i32 to index
    %c0_30 = arith.constant 0 : index
    %c0_31 = arith.constant 0 : index
    %115 = vector.load %arg1[%114, %c0_30, %c0_31] : memref<8x2x384xf32, #tpu.memory_space<vmem>>, vector<1x2x384xf32>
    %116 = vector.shape_cast %115 : vector<1x2x384xf32> to vector<2x384xf32>
    %cst_32 = arith.constant dense<0.000000e+00> : vector<2x384xf32>
    %117 = tpu.matmul %109, %3, %cst_32 {dimension_numbers = #tpu.dot_dimension_numbers<[1], [0], [0], [1], [0, 0, 1, 1], [], []>} : vector<2x128xf32>, vector<128x384xf32>, vector<2x384xf32> -> vector<2x384xf32>
    %118 = vector.extract_strided_slice %116 {offsets = [0, 0], sizes = [2, 128], strides = [1, 1]} : vector<2x384xf32> to vector<2x128xf32>
    %119 = vector.extract_strided_slice %117 {offsets = [0, 0], sizes = [2, 128], strides = [1, 1]} : vector<2x384xf32> to vector<2x128xf32>
    %120 = arith.addf %118, %119 : vector<2x128xf32>
    %121 = arith.negf %120 : vector<2x128xf32>
    %122 = math.exp %121 : vector<2x128xf32>
    %cst_33 = arith.constant 1.000000e+00 : f32
    %123 = vector.broadcast %cst_33 : f32 to vector<2x128xf32>
    %124 = arith.addf %123, %122 : vector<2x128xf32>
    %125 = arith.divf %123, %124 : vector<2x128xf32>
    %126 = vector.extract_strided_slice %116 {offsets = [0, 128], sizes = [2, 128], strides = [1, 1]} : vector<2x384xf32> to vector<2x128xf32>
    %127 = vector.extract_strided_slice %117 {offsets = [0, 128], sizes = [2, 128], strides = [1, 1]} : vector<2x384xf32> to vector<2x128xf32>
    %128 = arith.addf %126, %127 : vector<2x128xf32>
    %129 = arith.negf %128 : vector<2x128xf32>
    %130 = math.exp %129 : vector<2x128xf32>
    %cst_34 = arith.constant 1.000000e+00 : f32
    %131 = vector.broadcast %cst_34 : f32 to vector<2x128xf32>
    %132 = arith.addf %131, %130 : vector<2x128xf32>
    %133 = arith.divf %131, %132 : vector<2x128xf32>
    %134 = vector.extract_strided_slice %116 {offsets = [0, 256], sizes = [2, 128], strides = [1, 1]} : vector<2x384xf32> to vector<2x128xf32>
    %135 = vector.extract_strided_slice %117 {offsets = [0, 256], sizes = [2, 128], strides = [1, 1]} : vector<2x384xf32> to vector<2x128xf32>
    %136 = vector.broadcast %4 : vector<1x128xf32> to vector<2x128xf32>
    %137 = arith.addf %135, %136 : vector<2x128xf32>
    %138 = arith.mulf %125, %137 : vector<2x128xf32>
    %139 = arith.addf %134, %138 : vector<2x128xf32>
    %140 = math.tanh %139 : vector<2x128xf32>
    %cst_35 = arith.constant 1.000000e+00 : f32
    %141 = vector.broadcast %cst_35 : f32 to vector<2x128xf32>
    %142 = arith.subf %141, %133 : vector<2x128xf32>
    %143 = arith.mulf %142, %140 : vector<2x128xf32>
    %144 = arith.mulf %133, %109 : vector<2x128xf32>
    %145 = arith.addf %143, %144 : vector<2x128xf32>
    %146 = arith.index_cast %c3_i32 : i32 to index
    %c0_36 = arith.constant 0 : index
    %c0_37 = arith.constant 0 : index
    %147 = vector.load %arg4[%146, %c0_36, %c0_37] : memref<8x2x128xf32, #tpu.memory_space<vmem>>, vector<1x2x128xf32>
    %148 = vector.shape_cast %147 : vector<1x2x128xf32> to vector<2x128xf32>
    %149 = vector.shape_cast %145 : vector<2x128xf32> to vector<1x2x128xf32>
    tpu.vector_store %arg4[%146, %c0_36, %c0_37], %149 {strides = array<i32>} : memref<8x2x128xf32, #tpu.memory_space<vmem>>, vector<1x2x128xf32>,
    %c4_i32 = arith.constant 4 : i32
    %150 = arith.index_cast %c4_i32 : i32 to index
    %c0_38 = arith.constant 0 : index
    %c0_39 = arith.constant 0 : index
    %151 = vector.load %arg1[%150, %c0_38, %c0_39] : memref<8x2x384xf32, #tpu.memory_space<vmem>>, vector<1x2x384xf32>
    %152 = vector.shape_cast %151 : vector<1x2x384xf32> to vector<2x384xf32>
    %cst_40 = arith.constant dense<0.000000e+00> : vector<2x384xf32>
    %153 = tpu.matmul %145, %3, %cst_40 {dimension_numbers = #tpu.dot_dimension_numbers<[1], [0], [0], [1], [0, 0, 1, 1], [], []>} : vector<2x128xf32>, vector<128x384xf32>, vector<2x384xf32> -> vector<2x384xf32>
    %154 = vector.extract_strided_slice %152 {offsets = [0, 0], sizes = [2, 128], strides = [1, 1]} : vector<2x384xf32> to vector<2x128xf32>
    %155 = vector.extract_strided_slice %153 {offsets = [0, 0], sizes = [2, 128], strides = [1, 1]} : vector<2x384xf32> to vector<2x128xf32>
    %156 = arith.addf %154, %155 : vector<2x128xf32>
    %157 = arith.negf %156 : vector<2x128xf32>
    %158 = math.exp %157 : vector<2x128xf32>
    %cst_41 = arith.constant 1.000000e+00 : f32
    %159 = vector.broadcast %cst_41 : f32 to vector<2x128xf32>
    %160 = arith.addf %159, %158 : vector<2x128xf32>
    %161 = arith.divf %159, %160 : vector<2x128xf32>
    %162 = vector.extract_strided_slice %152 {offsets = [0, 128], sizes = [2, 128], strides = [1, 1]} : vector<2x384xf32> to vector<2x128xf32>
    %163 = vector.extract_strided_slice %153 {offsets = [0, 128], sizes = [2, 128], strides = [1, 1]} : vector<2x384xf32> to vector<2x128xf32>
    %164 = arith.addf %162, %163 : vector<2x128xf32>
    %165 = arith.negf %164 : vector<2x128xf32>
    %166 = math.exp %165 : vector<2x128xf32>
    %cst_42 = arith.constant 1.000000e+00 : f32
    %167 = vector.broadcast %cst_42 : f32 to vector<2x128xf32>
    %168 = arith.addf %167, %166 : vector<2x128xf32>
    %169 = arith.divf %167, %168 : vector<2x128xf32>
    %170 = vector.extract_strided_slice %152 {offsets = [0, 256], sizes = [2, 128], strides = [1, 1]} : vector<2x384xf32> to vector<2x128xf32>
    %171 = vector.extract_strided_slice %153 {offsets = [0, 256], sizes = [2, 128], strides = [1, 1]} : vector<2x384xf32> to vector<2x128xf32>
    %172 = vector.broadcast %4 : vector<1x128xf32> to vector<2x128xf32>
    %173 = arith.addf %171, %172 : vector<2x128xf32>
    %174 = arith.mulf %161, %173 : vector<2x128xf32>
    %175 = arith.addf %170, %174 : vector<2x128xf32>
    %176 = math.tanh %175 : vector<2x128xf32>
    %cst_43 = arith.constant 1.000000e+00 : f32
    %177 = vector.broadcast %cst_43 : f32 to vector<2x128xf32>
    %178 = arith.subf %177, %169 : vector<2x128xf32>
    %179 = arith.mulf %178, %176 : vector<2x128xf32>
    %180 = arith.mulf %169, %145 : vector<2x128xf32>
    %181 = arith.addf %179, %180 : vector<2x128xf32>
    %182 = arith.index_cast %c4_i32 : i32 to index
    %c0_44 = arith.constant 0 : index
    %c0_45 = arith.constant 0 : index
    %183 = vector.load %arg4[%182, %c0_44, %c0_45] : memref<8x2x128xf32, #tpu.memory_space<vmem>>, vector<1x2x128xf32>
    %184 = vector.shape_cast %183 : vector<1x2x128xf32> to vector<2x128xf32>
    %185 = vector.shape_cast %181 : vector<2x128xf32> to vector<1x2x128xf32>
    tpu.vector_store %arg4[%182, %c0_44, %c0_45], %185 {strides = array<i32>} : memref<8x2x128xf32, #tpu.memory_space<vmem>>, vector<1x2x128xf32>,
    %c5_i32 = arith.constant 5 : i32
    %186 = arith.index_cast %c5_i32 : i32 to index
    %c0_46 = arith.constant 0 : index
    %c0_47 = arith.constant 0 : index
    %187 = vector.load %arg1[%186, %c0_46, %c0_47] : memref<8x2x384xf32, #tpu.memory_space<vmem>>, vector<1x2x384xf32>
    %188 = vector.shape_cast %187 : vector<1x2x384xf32> to vector<2x384xf32>
    %cst_48 = arith.constant dense<0.000000e+00> : vector<2x384xf32>
    %189 = tpu.matmul %181, %3, %cst_48 {dimension_numbers = #tpu.dot_dimension_numbers<[1], [0], [0], [1], [0, 0, 1, 1], [], []>} : vector<2x128xf32>, vector<128x384xf32>, vector<2x384xf32> -> vector<2x384xf32>
    %190 = vector.extract_strided_slice %188 {offsets = [0, 0], sizes = [2, 128], strides = [1, 1]} : vector<2x384xf32> to vector<2x128xf32>
    %191 = vector.extract_strided_slice %189 {offsets = [0, 0], sizes = [2, 128], strides = [1, 1]} : vector<2x384xf32> to vector<2x128xf32>
    %192 = arith.addf %190, %191 : vector<2x128xf32>
    %193 = arith.negf %192 : vector<2x128xf32>
    %194 = math.exp %193 : vector<2x128xf32>
    %cst_49 = arith.constant 1.000000e+00 : f32
    %195 = vector.broadcast %cst_49 : f32 to vector<2x128xf32>
    %196 = arith.addf %195, %194 : vector<2x128xf32>
    %197 = arith.divf %195, %196 : vector<2x128xf32>
    %198 = vector.extract_strided_slice %188 {offsets = [0, 128], sizes = [2, 128], strides = [1, 1]} : vector<2x384xf32> to vector<2x128xf32>
    %199 = vector.extract_strided_slice %189 {offsets = [0, 128], sizes = [2, 128], strides = [1, 1]} : vector<2x384xf32> to vector<2x128xf32>
    %200 = arith.addf %198, %199 : vector<2x128xf32>
    %201 = arith.negf %200 : vector<2x128xf32>
    %202 = math.exp %201 : vector<2x128xf32>
    %cst_50 = arith.constant 1.000000e+00 : f32
    %203 = vector.broadcast %cst_50 : f32 to vector<2x128xf32>
    %204 = arith.addf %203, %202 : vector<2x128xf32>
    %205 = arith.divf %203, %204 : vector<2x128xf32>
    %206 = vector.extract_strided_slice %188 {offsets = [0, 256], sizes = [2, 128], strides = [1, 1]} : vector<2x384xf32> to vector<2x128xf32>
    %207 = vector.extract_strided_slice %189 {offsets = [0, 256], sizes = [2, 128], strides = [1, 1]} : vector<2x384xf32> to vector<2x128xf32>
    %208 = vector.broadcast %4 : vector<1x128xf32> to vector<2x128xf32>
    %209 = arith.addf %207, %208 : vector<2x128xf32>
    %210 = arith.mulf %197, %209 : vector<2x128xf32>
    %211 = arith.addf %206, %210 : vector<2x128xf32>
    %212 = math.tanh %211 : vector<2x128xf32>
    %cst_51 = arith.constant 1.000000e+00 : f32
    %213 = vector.broadcast %cst_51 : f32 to vector<2x128xf32>
    %214 = arith.subf %213, %205 : vector<2x128xf32>
    %215 = arith.mulf %214, %212 : vector<2x128xf32>
    %216 = arith.mulf %205, %181 : vector<2x128xf32>
    %217 = arith.addf %215, %216 : vector<2x128xf32>
    %218 = arith.index_cast %c5_i32 : i32 to index
    %c0_52 = arith.constant 0 : index
    %c0_53 = arith.constant 0 : index
    %219 = vector.load %arg4[%218, %c0_52, %c0_53] : memref<8x2x128xf32, #tpu.memory_space<vmem>>, vector<1x2x128xf32>
    %220 = vector.shape_cast %219 : vector<1x2x128xf32> to vector<2x128xf32>
    %221 = vector.shape_cast %217 : vector<2x128xf32> to vector<1x2x128xf32>
    tpu.vector_store %arg4[%218, %c0_52, %c0_53], %221 {strides = array<i32>} : memref<8x2x128xf32, #tpu.memory_space<vmem>>, vector<1x2x128xf32>,
    %c6_i32 = arith.constant 6 : i32
    %222 = arith.index_cast %c6_i32 : i32 to index
    %c0_54 = arith.constant 0 : index
    %c0_55 = arith.constant 0 : index
    %223 = vector.load %arg1[%222, %c0_54, %c0_55] : memref<8x2x384xf32, #tpu.memory_space<vmem>>, vector<1x2x384xf32>
    %224 = vector.shape_cast %223 : vector<1x2x384xf32> to vector<2x384xf32>
    %cst_56 = arith.constant dense<0.000000e+00> : vector<2x384xf32>
    %225 = tpu.matmul %217, %3, %cst_56 {dimension_numbers = #tpu.dot_dimension_numbers<[1], [0], [0], [1], [0, 0, 1, 1], [], []>} : vector<2x128xf32>, vector<128x384xf32>, vector<2x384xf32> -> vector<2x384xf32>
    %226 = vector.extract_strided_slice %224 {offsets = [0, 0], sizes = [2, 128], strides = [1, 1]} : vector<2x384xf32> to vector<2x128xf32>
    %227 = vector.extract_strided_slice %225 {offsets = [0, 0], sizes = [2, 128], strides = [1, 1]} : vector<2x384xf32> to vector<2x128xf32>
    %228 = arith.addf %226, %227 : vector<2x128xf32>
    %229 = arith.negf %228 : vector<2x128xf32>
    %230 = math.exp %229 : vector<2x128xf32>
    %cst_57 = arith.constant 1.000000e+00 : f32
    %231 = vector.broadcast %cst_57 : f32 to vector<2x128xf32>
    %232 = arith.addf %231, %230 : vector<2x128xf32>
    %233 = arith.divf %231, %232 : vector<2x128xf32>
    %234 = vector.extract_strided_slice %224 {offsets = [0, 128], sizes = [2, 128], strides = [1, 1]} : vector<2x384xf32> to vector<2x128xf32>
    %235 = vector.extract_strided_slice %225 {offsets = [0, 128], sizes = [2, 128], strides = [1, 1]} : vector<2x384xf32> to vector<2x128xf32>
    %236 = arith.addf %234, %235 : vector<2x128xf32>
    %237 = arith.negf %236 : vector<2x128xf32>
    %238 = math.exp %237 : vector<2x128xf32>
    %cst_58 = arith.constant 1.000000e+00 : f32
    %239 = vector.broadcast %cst_58 : f32 to vector<2x128xf32>
    %240 = arith.addf %239, %238 : vector<2x128xf32>
    %241 = arith.divf %239, %240 : vector<2x128xf32>
    %242 = vector.extract_strided_slice %224 {offsets = [0, 256], sizes = [2, 128], strides = [1, 1]} : vector<2x384xf32> to vector<2x128xf32>
    %243 = vector.extract_strided_slice %225 {offsets = [0, 256], sizes = [2, 128], strides = [1, 1]} : vector<2x384xf32> to vector<2x128xf32>
    %244 = vector.broadcast %4 : vector<1x128xf32> to vector<2x128xf32>
    %245 = arith.addf %243, %244 : vector<2x128xf32>
    %246 = arith.mulf %233, %245 : vector<2x128xf32>
    %247 = arith.addf %242, %246 : vector<2x128xf32>
    %248 = math.tanh %247 : vector<2x128xf32>
    %cst_59 = arith.constant 1.000000e+00 : f32
    %249 = vector.broadcast %cst_59 : f32 to vector<2x128xf32>
    %250 = arith.subf %249, %241 : vector<2x128xf32>
    %251 = arith.mulf %250, %248 : vector<2x128xf32>
    %252 = arith.mulf %241, %217 : vector<2x128xf32>
    %253 = arith.addf %251, %252 : vector<2x128xf32>
    %254 = arith.index_cast %c6_i32 : i32 to index
    %c0_60 = arith.constant 0 : index
    %c0_61 = arith.constant 0 : index
    %255 = vector.load %arg4[%254, %c0_60, %c0_61] : memref<8x2x128xf32, #tpu.memory_space<vmem>>, vector<1x2x128xf32>
    %256 = vector.shape_cast %255 : vector<1x2x128xf32> to vector<2x128xf32>
    %257 = vector.shape_cast %253 : vector<2x128xf32> to vector<1x2x128xf32>
    tpu.vector_store %arg4[%254, %c0_60, %c0_61], %257 {strides = array<i32>} : memref<8x2x128xf32, #tpu.memory_space<vmem>>, vector<1x2x128xf32>,
    %c7_i32 = arith.constant 7 : i32
    %258 = arith.index_cast %c7_i32 : i32 to index
    %c0_62 = arith.constant 0 : index
    %c0_63 = arith.constant 0 : index
    %259 = vector.load %arg1[%258, %c0_62, %c0_63] : memref<8x2x384xf32, #tpu.memory_space<vmem>>, vector<1x2x384xf32>
    %260 = vector.shape_cast %259 : vector<1x2x384xf32> to vector<2x384xf32>
    %cst_64 = arith.constant dense<0.000000e+00> : vector<2x384xf32>
    %261 = tpu.matmul %253, %3, %cst_64 {dimension_numbers = #tpu.dot_dimension_numbers<[1], [0], [0], [1], [0, 0, 1, 1], [], []>} : vector<2x128xf32>, vector<128x384xf32>, vector<2x384xf32> -> vector<2x384xf32>
    %262 = vector.extract_strided_slice %260 {offsets = [0, 0], sizes = [2, 128], strides = [1, 1]} : vector<2x384xf32> to vector<2x128xf32>
    %263 = vector.extract_strided_slice %261 {offsets = [0, 0], sizes = [2, 128], strides = [1, 1]} : vector<2x384xf32> to vector<2x128xf32>
    %264 = arith.addf %262, %263 : vector<2x128xf32>
    %265 = arith.negf %264 : vector<2x128xf32>
    %266 = math.exp %265 : vector<2x128xf32>
    %cst_65 = arith.constant 1.000000e+00 : f32
    %267 = vector.broadcast %cst_65 : f32 to vector<2x128xf32>
    %268 = arith.addf %267, %266 : vector<2x128xf32>
    %269 = arith.divf %267, %268 : vector<2x128xf32>
    %270 = vector.extract_strided_slice %260 {offsets = [0, 128], sizes = [2, 128], strides = [1, 1]} : vector<2x384xf32> to vector<2x128xf32>
    %271 = vector.extract_strided_slice %261 {offsets = [0, 128], sizes = [2, 128], strides = [1, 1]} : vector<2x384xf32> to vector<2x128xf32>
    %272 = arith.addf %270, %271 : vector<2x128xf32>
    %273 = arith.negf %272 : vector<2x128xf32>
    %274 = math.exp %273 : vector<2x128xf32>
    %cst_66 = arith.constant 1.000000e+00 : f32
    %275 = vector.broadcast %cst_66 : f32 to vector<2x128xf32>
    %276 = arith.addf %275, %274 : vector<2x128xf32>
    %277 = arith.divf %275, %276 : vector<2x128xf32>
    %278 = vector.extract_strided_slice %260 {offsets = [0, 256], sizes = [2, 128], strides = [1, 1]} : vector<2x384xf32> to vector<2x128xf32>
    %279 = vector.extract_strided_slice %261 {offsets = [0, 256], sizes = [2, 128], strides = [1, 1]} : vector<2x384xf32> to vector<2x128xf32>
    %280 = vector.broadcast %4 : vector<1x128xf32> to vector<2x128xf32>
    %281 = arith.addf %279, %280 : vector<2x128xf32>
    %282 = arith.mulf %269, %281 : vector<2x128xf32>
    %283 = arith.addf %278, %282 : vector<2x128xf32>
    %284 = math.tanh %283 : vector<2x128xf32>
    %cst_67 = arith.constant 1.000000e+00 : f32
    %285 = vector.broadcast %cst_67 : f32 to vector<2x128xf32>
    %286 = arith.subf %285, %277 : vector<2x128xf32>
    %287 = arith.mulf %286, %284 : vector<2x128xf32>
    %288 = arith.mulf %277, %253 : vector<2x128xf32>
    %289 = arith.addf %287, %288 : vector<2x128xf32>
    %290 = arith.index_cast %c7_i32 : i32 to index
    %c0_68 = arith.constant 0 : index
    %c0_69 = arith.constant 0 : index
    %291 = vector.load %arg4[%290, %c0_68, %c0_69] : memref<8x2x128xf32, #tpu.memory_space<vmem>>, vector<1x2x128xf32>
    %292 = vector.shape_cast %291 : vector<1x2x128xf32> to vector<2x128xf32>
    %293 = vector.shape_cast %289 : vector<2x128xf32> to vector<1x2x128xf32>
    tpu.vector_store %arg4[%290, %c0_68, %c0_69], %293 {strides = array<i32>} : memref<8x2x128xf32, #tpu.memory_space<vmem>>, vector<1x2x128xf32>,
    %c8_i32 = arith.constant 8 : i32
    %c0_70 = arith.constant 0 : index
    %c0_71 = arith.constant 0 : index
    %294 = vector.load %arg5[%c0_70, %c0_71] : memref<2x128xf32, #tpu.memory_space<vmem>>, vector<2x128xf32>
    tpu.vector_store %arg5[%c0_70, %c0_71], %289 {strides = array<i32>} : memref<2x128xf32, #tpu.memory_space<vmem>>, vector<2x128xf32>,
    return
  }
  func.func @transform_0(%arg0: i32) -> (i32, i32, i32) {
    %c0_i32 = arith.constant 0 : i32
    %c0_i32_0 = arith.constant 0 : i32
    %c0_i32_1 = arith.constant 0 : i32
    return %arg0, %c0_i32, %c0_i32_0 : i32, i32, i32
  }
  func.func @transform_1(%arg0: i32) -> (i32, i32) {
    %c0_i32 = arith.constant 0 : i32
    %c0_i32_0 = arith.constant 0 : i32
    %c0_i32_1 = arith.constant 0 : i32
    return %c0_i32, %c0_i32_0 : i32, i32
  }
  func.func @transform_2(%arg0: i32) -> (i32, i32) {
    %c0_i32 = arith.constant 0 : i32
    %c0_i32_0 = arith.constant 0 : i32
    %c0_i32_1 = arith.constant 0 : i32
    return %c0_i32, %c0_i32_0 : i32, i32
  }
  func.func @transform_3(%arg0: i32) -> (i32, i32, i32) {
    %c0_i32 = arith.constant 0 : i32
    %c0_i32_0 = arith.constant 0 : i32
    %c0_i32_1 = arith.constant 0 : i32
    return %arg0, %c0_i32, %c0_i32_0 : i32, i32, i32
  }
}

</mosaic_0001>

<bundles_post_ra>
// kernel: pres_pred_rnn_forward.1
= control target key start
LH: loop header
LB: loop body
LE: loop exit
PB: predicated region body
PF: predicated region fallthrough
CT: control target
= control target key end

     0   :  { %v3178_v3 = vmov 0.0   ;;  %vm2033_vm0 = vmmov 0   ;;  %s3174_s1 = inlined_call_operand.vmem [shape: f32[128,384], index: 1, kind: input, shape index: {}]   ;;  %s3175_s0 = inlined_call_operand.vmem [shape: f32[8,2,384], index: 0, kind: input, shape index: {}]   ;;  %s3176_s2 = inlined_call_operand.vmem [shape: f32[1,128], index: 2, kind: input, shape index: {}]   ;;  %s3177_s3 = inlined_call_operand.vmem [shape: f32[8,2,128], index: 3, kind: output, shape index: {}]  }
   0x1   :  { %v2057_v0 = vld [vmem:[%s3174_s1 + $0x170] sm:$0xff]  ;;  %v2062_v1 = vld [vmem:[%s3174_s1 + $0x168] sm:$0xff]  ;;  %v2067_v2 = vld [vmem:[%s3174_s1 + $0x158] sm:$0xff]  ;;  %1621 = vmatprep.subr.mxu1 %v3178_v3  ;;  %18 = vst [vmem:[#allocation2] sm:$0x3] %v3178_v3  ;;  %134 = vmatprep.mubr.f32.mxu0 %v3178_v3 }
   0x2   :  { %3197 = vst [vmem:[#allocation3_spill] sm:$0xff] %v2057_v0  ;;  %70 = vmatprep.subr.mxu0 %v2057_v0  ;;  %v2076_v4 = vld [vmem:[%s3174_s1 + $0x150] sm:$0xff]  ;;  %1653 = vmatprep.mubr.msk.f32.mxu1 %vm2033_vm0, %v3178_v3  ;;  %v2084_v5 = vld [vmem:[%s3174_s1 + $0x140] sm:$0xff]  ;;  %v2090_v6 = vld [vmem:[%s3174_s1 + $0x138] sm:$0xff] }
   0x3   :  { %71 = vmatpush1.msra.mxu0 %v2062_v1  ;;  %v2096_v7 = vld [vmem:[%s3174_s1 + $0x128] sm:$0xff]  ;;  %v2102_v8 = vld [vmem:[%s3174_s1 + $0x120] sm:$0xff]  ;;  %v2108_v9 = vld [vmem:[%s3174_s1 + $0x110] sm:$0xff] }
   0x4   :  { %72 = vmatprep.subr.mxu0 %v2067_v2  ;;  %v2114_v10 = vld [vmem:[%s3174_s1 + $0x108] sm:$0xff]  ;;  %v2120_v11 = vld [vmem:[%s3174_s1 + $0xf8] sm:$0xff]  ;;  %v2126_v12 = vld [vmem:[%s3174_s1 + $0xf0] sm:$0xff] }
   0x5   :  { %73 = vmatpush1.msra.mxu0 %v2076_v4  ;;  %v2132_v13 = vld [vmem:[%s3174_s1 + $0xe0] sm:$0xff]  ;;  %v2137_v14 = vld [vmem:[%s3174_s1 + $0x178] sm:$0xff]  ;;  %v2155_v17 = vld [vmem:[%s3174_s1 + $0xc8] sm:$0xff] }
   0x6   :  { %74 = vmatprep.subr.mxu0 %v2084_v5  ;;  %v2143_v15 = vld [vmem:[%s3174_s1 + $0xd8] sm:$0xff]  ;;  %1622 = vmatpush3.msra.mxu1 %v2137_v14  ;;  %v2149_v16 = vld [vmem:[%s3174_s1 + $0x160] sm:$0xff]  ;;  %v2161_v18 = vld [vmem:[%s3174_s1 + $0x148] sm:$0xff] }
   0x7   :  { %75 = vmatpush1.msra.mxu0 %v2090_v6  ;;  %1623 = vmatprep.subr.mxu1 %v3178_v3  ;;  %v2167_v19 = vld [vmem:[%s3174_s1 + $0xc0] sm:$0xff]  ;;  %v2174_v20 = vld [vmem:[%s3174_s1 + $0xb0] sm:$0xff]  ;;  %v2186_v22 = vld [vmem:[%s3174_s1 + $0xa8] sm:$0xff] }
   0x8   :  { %76 = vmatprep.subr.mxu0 %v2096_v7  ;;  %1624 = vmatpush3.msra.mxu1 %v2149_v16  ;;  %v2180_v21 = vld [vmem:[%s3174_s1 + $0x130] sm:$0xff]  ;;  %v2193_v23 = vld [vmem:[%s3174_s1 + $0x98] sm:$0xff]  ;;  %v2212_v26 = vld [vmem:[%s3174_s1 + $0x80] sm:$0xff] }
   0x9   :  { %77 = vmatpush1.msra.mxu0 %v2102_v8  ;;  %1625 = vmatprep.subr.mxu1 %v3178_v3  ;;  %v2199_v24 = vld [vmem:[%s3174_s1 + $0x118] sm:$0xff]  ;;  %v2205_v25 = vld [vmem:[%s3174_s1 + $0x90] sm:$0xff]  ;;  %v2218_v27 = vld [vmem:[%s3174_s1 + $0x100] sm:$0xff] }
   0xa   :  { %78 = vmatprep.subr.mxu0 %v2108_v9  ;;  %1626 = vmatpush3.msra.mxu1 %v2161_v18  ;;  %v2224_v28 = vld [vmem:[%s3174_s1 + $0x78] sm:$0xff]  ;;  %v2231_v29 = vld [vmem:[%s3174_s1 + $0x68] sm:$0xff]  ;;  %v2243_v31 = vld [vmem:[%s3174_s1 + $0x60] sm:$0xff] }
   0xb   :  { %79 = vmatpush1.msra.mxu0 %v2114_v10  ;;  %1627 = vmatprep.subr.mxu1 %v3178_v3  ;;  %v2237_v30 = vld [vmem:[%s3174_s1 + $0xe8] sm:$0xff]  ;;  %v2250_v32 = vld [vmem:[%s3174_s1 + $0x50] sm:$0xff]  ;;  %v2269_v35 = vld [vmem:[%s3174_s1 + $0x38] sm:$0xff] }
   0xc   :  { %80 = vmatprep.subr.mxu0 %v2120_v11  ;;  %1628 = vmatpush3.msra.mxu1 %v2180_v21  ;;  %v2256_v33 = vld [vmem:[%s3174_s1 + $0xd0] sm:$0xff]  ;;  %v2262_v34 = vld [vmem:[%s3174_s1 + $0x48] sm:$0xff]  ;;  %v2275_v36 = vld [vmem:[%s3174_s1 + $0xb8] sm:$0xff] }
   0xd   :  { %81 = vmatpush1.msra.mxu0 %v2126_v12  ;;  %1629 = vmatprep.subr.mxu1 %v3178_v3  ;;  %v2281_v37 = vld [vmem:[%s3174_s1 + $0x30] sm:$0xff]  ;;  %v2288_v38 = vld [vmem:[%s3174_s1 + $0x20] sm:$0xff]  ;;  %v2300_v40 = vld [vmem:[%s3174_s1 + $0x18] sm:$0xff] }
   0xe   :  { %82 = vmatprep.subr.mxu0 %v2132_v13  ;;  %1630 = vmatpush3.msra.mxu1 %v2199_v24  ;;  %v2294_v39 = vld [vmem:[%s3174_s1 + $0xa0] sm:$0xff]  ;;  %3198 = vst [vmem:[#allocation4_spill] sm:$0xff] %v2300_v40  ;;  %v2307_v41 = vld [vmem:[%s3174_s1 + $0x8] sm:$0xff]  ;;  %v2329_v45 = vld [vmem:[%s3174_s1 + $0x70] sm:$0xff] }
   0xf   :  { %83 = vmatpush1.msra.mxu0 %v2143_v15  ;;  %1631 = vmatprep.subr.mxu1 %v3178_v3  ;;  %3199 = vst [vmem:[#allocation5_spill] sm:$0xff] %v2307_v41  ;;  %v2313_v42 = vld [vmem:[%s3174_s1 + $0x88] sm:$0xff]  ;;  %v2319_v43 = vld [vmem:[%s3174_s1] sm:$0xff]  ;;  %v2338_v46 = vld [vmem:[%s3174_s1 + $0x58] sm:$0xff] }
  0x10   :  { %84 = vmatprep.subr.mxu0 %v2155_v17  ;;  %1632 = vmatpush3.msra.mxu1 %v2218_v27  ;;  %3200 = vst [vmem:[#allocation6_spill] sm:$0xff] %v2319_v43  ;;  %v2323_v44 = vld [vmem:[#allocation2] sm:$0x3]  ;;  %v2355_v48 = vld [vmem:[%s3174_s1 + $0x28] sm:$0xff]  ;;  %v2364_v49 = vld [vmem:[%s3174_s1 + $0x10] sm:$0xff] }
  0x11   :  { %85 = vmatpush1.msra.mxu0 %v2167_v19  ;;  %1633 = vmatprep.subr.mxu1 %v3178_v3  ;;  %v2346_v47 = vld [vmem:[%s3174_s1 + $0x40] sm:$0xff]  ;;  %3201 = vst [vmem:[#allocation7_spill] sm:$0xff] %v2355_v48  ;;  %3202 = vst [vmem:[#allocation8_spill] sm:$0xff] %v2364_v49 }
  0x12   :  { %86 = vmatprep.subr.mxu0 %v2174_v20  ;;  %1634 = vmatpush3.msra.mxu1 %v2237_v30  ;;  %v69_v50 = vld [vmem:[%s3175_s0] sm:$0x3f] }
  0x13   :  { %87 = vmatpush1.msra.mxu0 %v2186_v22  ;;  %1635 = vmatprep.subr.mxu1 %v3178_v3  ;;  %v219_v54 = vrot.slane %v69_v50, 2  ;;  %v2441_v63 = vld [vmem:[%s3176_s2] ss:$0 sm:$0xff] }
  0x14   :  { %88 = vmatprep.subr.mxu0 %v2193_v23  ;;  %1636 = vmatpush3.msra.mxu1 %v2256_v33 }
  0x15   :  { %89 = vmatpush1.msra.mxu0 %v2205_v25  ;;  %1637 = vmatprep.subr.mxu1 %v3178_v3 }
  0x16   :  { %90 = vmatprep.subr.mxu0 %v2212_v26  ;;  %1638 = vmatpush3.msra.mxu1 %v2275_v36 }
  0x17   :  { %91 = vmatpush1.msra.mxu0 %v2224_v28  ;;  %1639 = vmatprep.subr.mxu1 %v3178_v3 }
  0x18   :  { %92 = vmatprep.subr.mxu0 %v2231_v29  ;;  %1640 = vmatpush3.msra.mxu1 %v2294_v39 }
  0x19   :  { %93 = vmatpush1.msra.mxu0 %v2243_v31  ;;  %1641 = vmatprep.subr.mxu1 %v3178_v3 }
  0x1a   :  { %94 = vmatprep.subr.mxu0 %v2250_v32  ;;  %1642 = vmatpush3.msra.mxu1 %v2313_v42 }
  0x1b   :  { %95 = vmatpush1.msra.mxu0 %v2262_v34  ;;  %1643 = vmatprep.subr.mxu1 %v3178_v3 }
  0x1c   :  { %96 = vmatprep.subr.mxu0 %v2269_v35  ;;  %1644 = vmatpush3.msra.mxu1 %v2329_v45 }
  0x1d   :  { %97 = vmatpush1.msra.mxu0 %v2281_v37  ;;  %1645 = vmatprep.subr.mxu1 %v3178_v3 }
  0x1e   :  { %98 = vmatprep.subr.mxu0 %v2288_v38  ;;  %1646 = vmatpush3.msra.mxu1 %v2338_v46 }
  0x1f   :  { %99 = vmatpush1.msra.mxu0 %v2300_v40  ;;  %1647 = vmatprep.subr.mxu1 %v3178_v3 }
  0x20   :  { %100 = vmatprep.subr.mxu0 %v2307_v41  ;;  %1648 = vmatpush3.msra.mxu1 %v2346_v47 }
  0x21   :  { %101 = vmatpush1.msra.mxu0 %v2319_v43  ;;  %1649 = vmatprep.subr.mxu1 %v3178_v3 }
  0x22   :  { %135 = vmatmul.mubr.f32.vlgmr.msra.gmra.mxu0 %v2323_v44  ;;  %247 = vmatprep.subr.mxu0 %v2057_v0 }
  0x23   :  { %248 = vmatpush1.msra.mxu0 %v2062_v1  ;;  %1650 = vmatpush3.msra.mxu1 %v2355_v48 }
  0x24   :  { %249 = vmatprep.subr.mxu0 %v2067_v2  ;;  %1651 = vmatprep.subr.mxu1 %v3178_v3 }
  0x25   :  { %250 = vmatpush1.msra.mxu0 %v2076_v4  ;;  %1652 = vmatpush3.msra.mxu1 %v2364_v49 }
  0x26   :  { %251 = vmatprep.subr.mxu0 %v2084_v5  ;;  %1654 = vmatmul.mubr.f32.vlgmr.msra.gmra.mxu1 %v2323_v44 }
  0x27   :  { %252 = vmatpush1.msra.mxu0 %v2090_v6  ;;  %1656 = vmatprep.subr.mxu1 %v3178_v3 }
  0x28   :  { %253 = vmatprep.subr.mxu0 %v2096_v7  ;;  %1657 = vmatpush3.msra.mxu1 %v2137_v14 }
  0x29   :  { %254 = vmatpush1.msra.mxu0 %v2102_v8  ;;  %1658 = vmatprep.subr.mxu1 %v3178_v3 }
  0x2a   :  { %255 = vmatprep.subr.mxu0 %v2108_v9  ;;  %1659 = vmatpush3.msra.mxu1 %v2149_v16 }
  0x2b   :  { %256 = vmatpush1.msra.mxu0 %v2114_v10  ;;  %1660 = vmatprep.subr.mxu1 %v3178_v3 }
  0x2c   :  { %257 = vmatprep.subr.mxu0 %v2120_v11  ;;  %1661 = vmatpush3.msra.mxu1 %v2161_v18 }
  0x2d   :  { %258 = vmatpush1.msra.mxu0 %v2126_v12  ;;  %1662 = vmatprep.subr.mxu1 %v3178_v3 }
  0x2e   :  { %259 = vmatprep.subr.mxu0 %v2132_v13  ;;  %1663 = vmatpush3.msra.mxu1 %v2180_v21 }
  0x2f   :  { %260 = vmatpush1.msra.mxu0 %v2143_v15  ;;  %1664 = vmatprep.subr.mxu1 %v3178_v3 }
  0x30   :  { %261 = vmatprep.subr.mxu0 %v2155_v17  ;;  %1665 = vmatpush3.msra.mxu1 %v2199_v24 }
  0x31   :  { %262 = vmatpush1.msra.mxu0 %v2167_v19  ;;  %1666 = vmatprep.subr.mxu1 %v3178_v3 }
  0x32   :  { %263 = vmatprep.subr.mxu0 %v2174_v20  ;;  %1667 = vmatpush3.msra.mxu1 %v2218_v27 }
  0x33   :  { %264 = vmatpush1.msra.mxu0 %v2186_v22  ;;  %1668 = vmatprep.subr.mxu1 %v3178_v3 }
  0x34   :  { %265 = vmatprep.subr.mxu0 %v2193_v23  ;;  %1669 = vmatpush3.msra.mxu1 %v2237_v30 }
  0x35   :  { %266 = vmatpush1.msra.mxu0 %v2205_v25  ;;  %1670 = vmatprep.subr.mxu1 %v3178_v3 }
  0x36   :  { %267 = vmatprep.subr.mxu0 %v2212_v26  ;;  %1671 = vmatpush3.msra.mxu1 %v2256_v33 }
  0x37   :  { %268 = vmatpush1.msra.mxu0 %v2224_v28  ;;  %1672 = vmatprep.subr.mxu1 %v3178_v3 }
  0x38   :  { %269 = vmatprep.subr.mxu0 %v2231_v29  ;;  %1673 = vmatpush3.msra.mxu1 %v2275_v36 }
  0x39   :  { %270 = vmatpush1.msra.mxu0 %v2243_v31  ;;  %1674 = vmatprep.subr.mxu1 %v3178_v3 }
  0x3a   :  { %271 = vmatprep.subr.mxu0 %v2250_v32  ;;  %1675 = vmatpush3.msra.mxu1 %v2294_v39 }
  0x3b   :  { %272 = vmatpush1.msra.mxu0 %v2262_v34  ;;  %1676 = vmatprep.subr.mxu1 %v3178_v3 }
  0x3c   :  { %273 = vmatprep.subr.mxu0 %v2269_v35  ;;  %1677 = vmatpush3.msra.mxu1 %v2313_v42 }
  0x3d   :  { %274 = vmatpush1.msra.mxu0 %v2281_v37  ;;  %1678 = vmatprep.subr.mxu1 %v3178_v3 }
  0x3e   :  { %275 = vmatprep.subr.mxu0 %v2288_v38  ;;  %1679 = vmatpush3.msra.mxu1 %v2329_v45 }
  0x3f   :  { %276 = vmatpush1.msra.mxu0 %v2300_v40  ;;  %1680 = vmatprep.subr.mxu1 %v3178_v3 }
  0x40   :  { %277 = vmatprep.subr.mxu0 %v2307_v41  ;;  %1681 = vmatpush3.msra.mxu1 %v2338_v46 }
  0x41   :  { %278 = vmatpush1.msra.mxu0 %v2319_v43  ;;  %311 = vmatprep.mubr.f32.mxu0 %v3178_v3 }
  0x42   :  { %1682 = vmatprep.subr.mxu1 %v3178_v3  ;;  %1688 = vmatprep.mubr.msk.f32.mxu1 %vm2033_vm0, %v3178_v3 }
  0x43   :  { %1683 = vmatpush3.msra.mxu1 %v2346_v47  ;;  %419 = vmatprep.subr.mxu0 %v2057_v0 }
  0x44   :  { %1684 = vmatprep.subr.mxu1 %v3178_v3 }
  0x45   :  { %1685 = vmatpush3.msra.mxu1 %v2355_v48 }
  0x46   :  { %1686 = vmatprep.subr.mxu1 %v3178_v3 }
  0x47   :  { %1687 = vmatpush3.msra.mxu1 %v2364_v49 }
  0x48   :  { %1691 = vmatprep.subr.mxu1 %v3178_v3 }
  0xe2   :  { %v136_v51 = vpop.f32.mrf.mxu0 }
  0xe3   :  { %v211_v52 = vadd.f32 %v136_v51, %v69_v50 }
  0xe4   :  { %v138_v55 = vpop.f32.mrf.mxu0 }
  0xe5   :  { %v1454_v53 = vmul.f32 -1.442695, %v211_v52  ;;  %v221_v56 = vadd.f32 %v219_v54, %v138_v55  ;;  %v236_v52 = vrot.slane %v69_v50, 4 }
  0xe6   :  { %v207_v57 = vpop.f32.mrf.mxu1 }
  0xe7   :  { %1903 = vpow2.f32 %v1454_v53  ;;  %v1455_v58 = vmul.f32 -1.442695, %v221_v56  ;;  %v234_v51 = vadd.f32 %v2441_v63, %v207_v57 }
  0xe8   :  { %v1655_v59 = vpop.f32.mrf.mxu1 }
  0xe9   :  { %1905 = vpow2.f32 %v1455_v58 }
  0xf4   :  { %v1904_v60 = vpop.eup %1903 }
  0xf5   :  { %v215_v61 = vadd.f32 1.0, %v1904_v60 }
  0xf6   :  { %v1906_v62 = vpop.eup %1905 }
  0xf7   :  { %1907 = vrcp.f32 %v215_v61  ;;  %v225_v3 = vadd.f32 1.0, %v1906_v62 }
  0xf9   :  { %1909 = vrcp.f32 %v225_v3  ;;  %v3204_v3 = vld [vmem:[#allocation3_spill] sm:$0xff] }
 0x104   :  { %v1908_v0 = vpop.eup %1907 }
 0x105   :  { %v235_v53 = vmul.f32 %v1908_v0, %v234_v51  ;;  %v3203_v0 = vmov 0.0  }
 0x106   :  { %v1910_v55 = vpop.eup %1909 }
 0x107   :  { %v238_v54 = vadd.f32 %v236_v52, %v235_v53  ;;  %v240_v56 = vsub.f32 1.0, %v1910_v55  ;;  %v242_v60 = vmul.f32 %v1910_v55, %v2323_v44  ;;  %v1457_v44 = vld [vmem:[%s3175_s0 + $0x6] sm:$0x3f] }
 0x108   :  { %v396_v53 = vrot.slane %v1457_v44, 2 }
 0x109   :  { %1911 = vtanh.f32 %v238_v54 }
 0x116   :  { %v1912_v58 = vpop.eup %1911 }
 0x117   :  { %v241_v59 = vmul.f32 %v1912_v58, %v240_v56 }
 0x119   :  { %v2445_v61 = vadd.f32 %v242_v60, %v241_v59 }
 0x11b   :  { %244 = vst [vmem:[%s3177_s3] sm:$0x3] %v2445_v61  ;;  %312 = vmatmul.mubr.f32.vlgmr.msra.gmra.mxu0 %v2445_v61  ;;  %1689 = vmatmul.mubr.f32.vlgmr.msra.gmra.mxu1 %v2445_v61 }
 0x11c   :  { %420 = vmatpush1.msra.mxu0 %v2062_v1  ;;  %1692 = vmatpush3.msra.mxu1 %v2137_v14 }
 0x11d   :  { %421 = vmatprep.subr.mxu0 %v2067_v2  ;;  %1693 = vmatprep.subr.mxu1 %v3203_v0 }
 0x11e   :  { %422 = vmatpush1.msra.mxu0 %v2076_v4  ;;  %1694 = vmatpush3.msra.mxu1 %v2149_v16 }
 0x11f   :  { %423 = vmatprep.subr.mxu0 %v2084_v5  ;;  %1695 = vmatprep.subr.mxu1 %v3203_v0 }
 0x120   :  { %424 = vmatpush1.msra.mxu0 %v2090_v6  ;;  %1696 = vmatpush3.msra.mxu1 %v2161_v18 }
 0x121   :  { %425 = vmatprep.subr.mxu0 %v2096_v7  ;;  %1697 = vmatprep.subr.mxu1 %v3203_v0 }
 0x122   :  { %426 = vmatpush1.msra.mxu0 %v2102_v8  ;;  %1698 = vmatpush3.msra.mxu1 %v2180_v21 }
 0x123   :  { %427 = vmatprep.subr.mxu0 %v2108_v9  ;;  %1699 = vmatprep.subr.mxu1 %v3203_v0 }
 0x124   :  { %428 = vmatpush1.msra.mxu0 %v2114_v10  ;;  %1700 = vmatpush3.msra.mxu1 %v2199_v24 }
 0x125   :  { %429 = vmatprep.subr.mxu0 %v2120_v11  ;;  %1701 = vmatprep.subr.mxu1 %v3203_v0 }
 0x126   :  { %430 = vmatpush1.msra.mxu0 %v2126_v12  ;;  %1702 = vmatpush3.msra.mxu1 %v2218_v27 }
 0x127   :  { %431 = vmatprep.subr.mxu0 %v2132_v13  ;;  %1703 = vmatprep.subr.mxu1 %v3203_v0 }
 0x128   :  { %432 = vmatpush1.msra.mxu0 %v2143_v15  ;;  %1704 = vmatpush3.msra.mxu1 %v2237_v30 }
 0x129   :  { %433 = vmatprep.subr.mxu0 %v2155_v17  ;;  %1705 = vmatprep.subr.mxu1 %v3203_v0 }
 0x12a   :  { %434 = vmatpush1.msra.mxu0 %v2167_v19  ;;  %1706 = vmatpush3.msra.mxu1 %v2256_v33 }
 0x12b   :  { %435 = vmatprep.subr.mxu0 %v2174_v20  ;;  %1707 = vmatprep.subr.mxu1 %v3203_v0 }
 0x12c   :  { %436 = vmatpush1.msra.mxu0 %v2186_v22  ;;  %1708 = vmatpush3.msra.mxu1 %v2275_v36 }
 0x12d   :  { %437 = vmatprep.subr.mxu0 %v2193_v23  ;;  %1709 = vmatprep.subr.mxu1 %v3203_v0 }
 0x12e   :  { %438 = vmatpush1.msra.mxu0 %v2205_v25  ;;  %1710 = vmatpush3.msra.mxu1 %v2294_v39 }
 0x12f   :  { %439 = vmatprep.subr.mxu0 %v2212_v26  ;;  %1711 = vmatprep.subr.mxu1 %v3203_v0 }
 0x130   :  { %440 = vmatpush1.msra.mxu0 %v2224_v28  ;;  %1712 = vmatpush3.msra.mxu1 %v2313_v42 }
 0x131   :  { %441 = vmatprep.subr.mxu0 %v2231_v29  ;;  %1713 = vmatprep.subr.mxu1 %v3203_v0 }
 0x132   :  { %442 = vmatpush1.msra.mxu0 %v2243_v31  ;;  %1714 = vmatpush3.msra.mxu1 %v2329_v45 }
 0x133   :  { %443 = vmatprep.subr.mxu0 %v2250_v32  ;;  %1715 = vmatprep.subr.mxu1 %v3203_v0 }
 0x134   :  { %444 = vmatpush1.msra.mxu0 %v2262_v34  ;;  %1716 = vmatpush3.msra.mxu1 %v2338_v46 }
 0x135   :  { %445 = vmatprep.subr.mxu0 %v2269_v35  ;;  %1717 = vmatprep.subr.mxu1 %v3203_v0 }
 0x136   :  { %446 = vmatpush1.msra.mxu0 %v2281_v37  ;;  %1718 = vmatpush3.msra.mxu1 %v2346_v47 }
 0x137   :  { %447 = vmatprep.subr.mxu0 %v2288_v38  ;;  %1719 = vmatprep.subr.mxu1 %v3203_v0 }
 0x138   :  { %448 = vmatpush1.msra.mxu0 %v2300_v40  ;;  %1720 = vmatpush3.msra.mxu1 %v2355_v48 }
 0x139   :  { %449 = vmatprep.subr.mxu0 %v2307_v41  ;;  %1721 = vmatprep.subr.mxu1 %v3203_v0 }
 0x13a   :  { %450 = vmatpush1.msra.mxu0 %v2319_v43  ;;  %483 = vmatprep.mubr.f32.mxu0 %v3203_v0 }
 0x13b   :  { %1722 = vmatpush3.msra.mxu1 %v2364_v49  ;;  %1723 = vmatprep.mubr.msk.f32.mxu1 %vm2033_vm0, %v3203_v0  ;;  %v407_v49 = vrot.slane %v1457_v44, 4 }
 0x13c   :  { %591 = vmatprep.subr.mxu0 %v3204_v3  ;;  %1726 = vmatprep.subr.mxu1 %v3203_v0 }
 0x1db   :  { %v313_v50 = vpop.f32.mrf.mxu0  ;;  %v384_v57 = vpop.f32.mrf.mxu1 }
 0x1dc   :  { %v388_v62 = vadd.f32 %v1457_v44, %v313_v50  ;;  %v405_v43 = vadd.f32 %v2441_v63, %v384_v57 }
 0x1dd   :  { %v1690_v51 = vpop.f32.mrf.mxu1  ;;  %v315_v54 = vpop.f32.mrf.mxu0 }
 0x1de   :  { %v1458_v52 = vmul.f32 -1.442695, %v388_v62  ;;  %v398_v55 = vadd.f32 %v396_v53, %v315_v54 }
 0x1e0   :  { %1913 = vpow2.f32 %v1458_v52  ;;  %v1459_v56 = vmul.f32 -1.442695, %v398_v55 }
 0x1e2   :  { %1915 = vpow2.f32 %v1459_v56 }
 0x1ed   :  { %v1914_v58 = vpop.eup %1913 }
 0x1ee   :  { %v392_v59 = vadd.f32 1.0, %v1914_v58 }
 0x1ef   :  { %v1916_v60 = vpop.eup %1915 }
 0x1f0   :  { %1917 = vrcp.f32 %v392_v59  ;;  %v402_v3 = vadd.f32 1.0, %v1916_v60 }
 0x1f2   :  { %1919 = vrcp.f32 %v402_v3  ;;  %v1461_v3 = vld [vmem:[%s3175_s0 + $0xc] sm:$0x3f] }
 0x1f3   :  { %v568_v59 = vrot.slane %v1461_v3, 2 }
 0x1fd   :  { %v1918_v41 = vpop.eup %1917 }
 0x1fe   :  { %v406_v48 = vmul.f32 %v1918_v41, %v405_v43  ;;  %v3206_v41 = vld [vmem:[#allocation7_spill] sm:$0xff]  ;;  %v3207_v43 = vld [vmem:[#allocation5_spill] sm:$0xff] }
 0x1ff   :  { %v1920_v62 = vpop.eup %1919 }
 0x200   :  { %v409_v50 = vadd.f32 %v407_v49, %v406_v48  ;;  %v411_v51 = vsub.f32 1.0, %v1920_v62  ;;  %v413_v53 = vmul.f32 %v1920_v62, %v2445_v61  ;;  %v3208_v48 = vld [vmem:[#allocation6_spill] sm:$0xff]  ;;  %v3209_v49 = vld [vmem:[#allocation8_spill] sm:$0xff]  ;;  %v3210_v61 = vld [vmem:[#allocation3_spill] sm:$0xff] }
 0x202   :  { %1921 = vtanh.f32 %v409_v50 }
 0x20f   :  { %v1922_v40 = vpop.eup %1921 }
 0x210   :  { %v412_v52 = vmul.f32 %v1922_v40, %v411_v51  ;;  %v3205_v40 = vld [vmem:[#allocation4_spill] sm:$0xff] }
 0x212   :  { %v2525_v54 = vadd.f32 %v413_v53, %v412_v52 }
 0x214   :  { %1460 = vst [vmem:[%s3177_s3 + $0x2] sm:$0x3] %v2525_v54  ;;  %484 = vmatmul.mubr.f32.vlgmr.msra.gmra.mxu0 %v2525_v54  ;;  %1724 = vmatmul.mubr.f32.vlgmr.msra.gmra.mxu1 %v2525_v54 }
 0x215   :  { %592 = vmatpush1.msra.mxu0 %v2062_v1  ;;  %1727 = vmatpush3.msra.mxu1 %v2137_v14 }
 0x216   :  { %593 = vmatprep.subr.mxu0 %v2067_v2  ;;  %1728 = vmatprep.subr.mxu1 %v3203_v0 }
 0x217   :  { %594 = vmatpush1.msra.mxu0 %v2076_v4  ;;  %1729 = vmatpush3.msra.mxu1 %v2149_v16 }
 0x218   :  { %595 = vmatprep.subr.mxu0 %v2084_v5  ;;  %1730 = vmatprep.subr.mxu1 %v3203_v0 }
 0x219   :  { %596 = vmatpush1.msra.mxu0 %v2090_v6  ;;  %1731 = vmatpush3.msra.mxu1 %v2161_v18 }
 0x21a   :  { %597 = vmatprep.subr.mxu0 %v2096_v7  ;;  %1732 = vmatprep.subr.mxu1 %v3203_v0 }
 0x21b   :  { %598 = vmatpush1.msra.mxu0 %v2102_v8  ;;  %1733 = vmatpush3.msra.mxu1 %v2180_v21 }
 0x21c   :  { %599 = vmatprep.subr.mxu0 %v2108_v9  ;;  %1734 = vmatprep.subr.mxu1 %v3203_v0 }
 0x21d   :  { %600 = vmatpush1.msra.mxu0 %v2114_v10  ;;  %1735 = vmatpush3.msra.mxu1 %v2199_v24 }
 0x21e   :  { %601 = vmatprep.subr.mxu0 %v2120_v11  ;;  %1736 = vmatprep.subr.mxu1 %v3203_v0 }
 0x21f   :  { %602 = vmatpush1.msra.mxu0 %v2126_v12  ;;  %1737 = vmatpush3.msra.mxu1 %v2218_v27 }
 0x220   :  { %603 = vmatprep.subr.mxu0 %v2132_v13  ;;  %1738 = vmatprep.subr.mxu1 %v3203_v0 }
 0x221   :  { %604 = vmatpush1.msra.mxu0 %v2143_v15  ;;  %1739 = vmatpush3.msra.mxu1 %v2237_v30 }
 0x222   :  { %605 = vmatprep.subr.mxu0 %v2155_v17  ;;  %1740 = vmatprep.subr.mxu1 %v3203_v0 }
 0x223   :  { %606 = vmatpush1.msra.mxu0 %v2167_v19  ;;  %1741 = vmatpush3.msra.mxu1 %v2256_v33 }
 0x224   :  { %607 = vmatprep.subr.mxu0 %v2174_v20  ;;  %1742 = vmatprep.subr.mxu1 %v3203_v0 }
 0x225   :  { %608 = vmatpush1.msra.mxu0 %v2186_v22  ;;  %1743 = vmatpush3.msra.mxu1 %v2275_v36 }
 0x226   :  { %609 = vmatprep.subr.mxu0 %v2193_v23  ;;  %1744 = vmatprep.subr.mxu1 %v3203_v0 }
 0x227   :  { %610 = vmatpush1.msra.mxu0 %v2205_v25  ;;  %1745 = vmatpush3.msra.mxu1 %v2294_v39 }
 0x228   :  { %611 = vmatprep.subr.mxu0 %v2212_v26  ;;  %1746 = vmatprep.subr.mxu1 %v3203_v0 }
 0x229   :  { %612 = vmatpush1.msra.mxu0 %v2224_v28  ;;  %1747 = vmatpush3.msra.mxu1 %v2313_v42 }
 0x22a   :  { %613 = vmatprep.subr.mxu0 %v2231_v29  ;;  %1748 = vmatprep.subr.mxu1 %v3203_v0 }
 0x22b   :  { %614 = vmatpush1.msra.mxu0 %v2243_v31  ;;  %1749 = vmatpush3.msra.mxu1 %v2329_v45 }
 0x22c   :  { %615 = vmatprep.subr.mxu0 %v2250_v32  ;;  %1750 = vmatprep.subr.mxu1 %v3203_v0 }
 0x22d   :  { %616 = vmatpush1.msra.mxu0 %v2262_v34  ;;  %1751 = vmatpush3.msra.mxu1 %v2338_v46 }
 0x22e   :  { %617 = vmatprep.subr.mxu0 %v2269_v35  ;;  %1752 = vmatprep.subr.mxu1 %v3203_v0 }
 0x22f   :  { %618 = vmatpush1.msra.mxu0 %v2281_v37  ;;  %1753 = vmatpush3.msra.mxu1 %v2346_v47 }
 0x230   :  { %619 = vmatprep.subr.mxu0 %v2288_v38  ;;  %1754 = vmatprep.subr.mxu1 %v3203_v0 }
 0x231   :  { %620 = vmatpush1.msra.mxu0 %v3205_v40  ;;  %1755 = vmatpush3.msra.mxu1 %v3206_v41 }
 0x232   :  { %621 = vmatprep.subr.mxu0 %v3207_v43  ;;  %1756 = vmatprep.subr.mxu1 %v3203_v0 }
 0x233   :  { %622 = vmatpush1.msra.mxu0 %v3208_v48  ;;  %655 = vmatprep.mubr.f32.mxu0 %v3203_v0 }
 0x234   :  { %1757 = vmatpush3.msra.mxu1 %v3209_v49  ;;  %1758 = vmatprep.mubr.msk.f32.mxu1 %vm2033_vm0, %v3203_v0  ;;  %v579_v49 = vrot.slane %v1461_v3, 4 }
 0x235   :  { %763 = vmatprep.subr.mxu0 %v3210_v61  ;;  %1761 = vmatprep.subr.mxu1 %v3203_v0 }
 0x2d4   :  { %v485_v44 = vpop.f32.mrf.mxu0  ;;  %v556_v57 = vpop.f32.mrf.mxu1 }
 0x2d5   :  { %v560_v55 = vadd.f32 %v1461_v3, %v485_v44  ;;  %v577_v48 = vadd.f32 %v2441_v63, %v556_v57 }
 0x2d6   :  { %v1725_v56 = vpop.f32.mrf.mxu1  ;;  %v487_v60 = vpop.f32.mrf.mxu0 }
 0x2d7   :  { %v1462_v58 = vmul.f32 -1.442695, %v560_v55  ;;  %v570_v50 = vadd.f32 %v568_v59, %v487_v60 }
 0x2d9   :  { %1923 = vpow2.f32 %v1462_v58  ;;  %v1463_v62 = vmul.f32 -1.442695, %v570_v50 }
 0x2db   :  { %1925 = vpow2.f32 %v1463_v62 }
 0x2e6   :  { %v1924_v51 = vpop.eup %1923 }
 0x2e7   :  { %v564_v52 = vadd.f32 1.0, %v1924_v51 }
 0x2e8   :  { %v1926_v53 = vpop.eup %1925 }
 0x2e9   :  { %1927 = vrcp.f32 %v564_v52  ;;  %v574_v61 = vadd.f32 1.0, %v1926_v53 }
 0x2eb   :  { %1929 = vrcp.f32 %v574_v61 }
 0x2f6   :  { %v1928_v43 = vpop.eup %1927 }
 0x2f7   :  { %v578_v41 = vmul.f32 %v1928_v43, %v577_v48 }
 0x2f8   :  { %v1930_v55 = vpop.eup %1929 }
 0x2f9   :  { %v581_v44 = vadd.f32 %v579_v49, %v578_v41  ;;  %v583_v56 = vsub.f32 1.0, %v1930_v55  ;;  %v585_v59 = vmul.f32 %v1930_v55, %v2525_v54 }
 0x2fb   :  { %1931 = vtanh.f32 %v581_v44 }
 0x308   :  { %v1932_v40 = vpop.eup %1931 }
 0x309   :  { %v584_v58 = vmul.f32 %v1932_v40, %v583_v56 }
 0x30b   :  { %v2605_v60 = vadd.f32 %v585_v59, %v584_v58  ;;  %v2696_v58 = vld [vmem:[%s3174_s1 + $0x168] sm:$0xff]  ;;  %v2703_v59 = vld [vmem:[%s3174_s1 + $0x158] sm:$0xff] }
 0x30d   :  { %1464 = vst [vmem:[%s3177_s3 + $0x4] sm:$0x3] %v2605_v60  ;;  %656 = vmatmul.mubr.f32.vlgmr.msra.gmra.mxu0 %v2605_v60  ;;  %1759 = vmatmul.mubr.f32.vlgmr.msra.gmra.mxu1 %v2605_v60 }
 0x30e   :  { %764 = vmatpush1.msra.mxu0 %v2062_v1  ;;  %1762 = vmatpush3.msra.mxu1 %v2137_v14  ;;  %v3211_v1 = vld [vmem:[#allocation4_spill] sm:$0xff] }
 0x30f   :  { %765 = vmatprep.subr.mxu0 %v2067_v2  ;;  %1763 = vmatprep.subr.mxu1 %v3203_v0  ;;  %v3212_v2 = vld [vmem:[#allocation7_spill] sm:$0xff] }
 0x310   :  { %766 = vmatpush1.msra.mxu0 %v2076_v4  ;;  %1764 = vmatpush3.msra.mxu1 %v2149_v16  ;;  %v3213_v4 = vld [vmem:[#allocation5_spill] sm:$0xff] }
 0x311   :  { %767 = vmatprep.subr.mxu0 %v2084_v5  ;;  %1765 = vmatprep.subr.mxu1 %v3203_v0  ;;  %v3214_v5 = vld [vmem:[#allocation6_spill] sm:$0xff] }
 0x312   :  { %768 = vmatpush1.msra.mxu0 %v2090_v6  ;;  %1766 = vmatpush3.msra.mxu1 %v2161_v18  ;;  %v3215_v6 = vld [vmem:[#allocation8_spill] sm:$0xff] }
 0x313   :  { %769 = vmatprep.subr.mxu0 %v2096_v7  ;;  %1767 = vmatprep.subr.mxu1 %v3203_v0  ;;  %v3216_v7 = vld [vmem:[#allocation3_spill] sm:$0xff] }
 0x314   :  { %770 = vmatpush1.msra.mxu0 %v2102_v8  ;;  %1768 = vmatpush3.msra.mxu1 %v2180_v21  ;;  %v1465_v8 = vld [vmem:[%s3175_s0 + $0x12] sm:$0x3f] }
 0x315   :  { %771 = vmatprep.subr.mxu0 %v2108_v9  ;;  %1769 = vmatprep.subr.mxu1 %v3203_v0  ;;  %v751_v61 = vrot.slane %v1465_v8, 4 }
 0x316   :  { %772 = vmatpush1.msra.mxu0 %v2114_v10  ;;  %1770 = vmatpush3.msra.mxu1 %v2199_v24 }
 0x317   :  { %773 = vmatprep.subr.mxu0 %v2120_v11  ;;  %1771 = vmatprep.subr.mxu1 %v3203_v0 }
 0x318   :  { %774 = vmatpush1.msra.mxu0 %v2126_v12  ;;  %1772 = vmatpush3.msra.mxu1 %v2218_v27 }
 0x319   :  { %775 = vmatprep.subr.mxu0 %v2132_v13  ;;  %1773 = vmatprep.subr.mxu1 %v3203_v0 }
 0x31a   :  { %776 = vmatpush1.msra.mxu0 %v2143_v15  ;;  %1774 = vmatpush3.msra.mxu1 %v2237_v30  ;;  %v740_v15 = vrot.slane %v1465_v8, 2 }
 0x31b   :  { %777 = vmatprep.subr.mxu0 %v2155_v17  ;;  %1775 = vmatprep.subr.mxu1 %v3203_v0 }
 0x31c   :  { %778 = vmatpush1.msra.mxu0 %v2167_v19  ;;  %1776 = vmatpush3.msra.mxu1 %v2256_v33 }
 0x31d   :  { %779 = vmatprep.subr.mxu0 %v2174_v20  ;;  %1777 = vmatprep.subr.mxu1 %v3203_v0 }
 0x31e   :  { %780 = vmatpush1.msra.mxu0 %v2186_v22  ;;  %1778 = vmatpush3.msra.mxu1 %v2275_v36 }
 0x31f   :  { %781 = vmatprep.subr.mxu0 %v2193_v23  ;;  %1779 = vmatprep.subr.mxu1 %v3203_v0 }
 0x320   :  { %782 = vmatpush1.msra.mxu0 %v2205_v25  ;;  %1780 = vmatpush3.msra.mxu1 %v2294_v39 }
 0x321   :  { %783 = vmatprep.subr.mxu0 %v2212_v26  ;;  %1781 = vmatprep.subr.mxu1 %v3203_v0 }
 0x322   :  { %784 = vmatpush1.msra.mxu0 %v2224_v28  ;;  %1782 = vmatpush3.msra.mxu1 %v2313_v42 }
 0x323   :  { %785 = vmatprep.subr.mxu0 %v2231_v29  ;;  %1783 = vmatprep.subr.mxu1 %v3203_v0 }
 0x324   :  { %786 = vmatpush1.msra.mxu0 %v2243_v31  ;;  %1784 = vmatpush3.msra.mxu1 %v2329_v45 }
 0x325   :  { %787 = vmatprep.subr.mxu0 %v2250_v32  ;;  %1785 = vmatprep.subr.mxu1 %v3203_v0 }
 0x326   :  { %788 = vmatpush1.msra.mxu0 %v2262_v34  ;;  %1786 = vmatpush3.msra.mxu1 %v2338_v46 }
 0x327   :  { %789 = vmatprep.subr.mxu0 %v2269_v35  ;;  %1787 = vmatprep.subr.mxu1 %v3203_v0 }
 0x328   :  { %790 = vmatpush1.msra.mxu0 %v2281_v37  ;;  %1788 = vmatpush3.msra.mxu1 %v2346_v47 }
 0x329   :  { %791 = vmatprep.subr.mxu0 %v2288_v38  ;;  %1789 = vmatprep.subr.mxu1 %v3203_v0 }
 0x32a   :  { %792 = vmatpush1.msra.mxu0 %v3211_v1  ;;  %1790 = vmatpush3.msra.mxu1 %v3212_v2 }
 0x32b   :  { %793 = vmatprep.subr.mxu0 %v3213_v4  ;;  %1791 = vmatprep.subr.mxu1 %v3203_v0 }
 0x32c   :  { %794 = vmatpush1.msra.mxu0 %v3214_v5  ;;  %827 = vmatprep.mubr.f32.mxu0 %v3203_v0 }
 0x32d   :  { %1792 = vmatpush3.msra.mxu1 %v3215_v6  ;;  %1793 = vmatprep.mubr.msk.f32.mxu1 %vm2033_vm0, %v3203_v0 }
 0x32e   :  { %935 = vmatprep.subr.mxu0 %v3216_v7  ;;  %1796 = vmatprep.subr.mxu1 %v3203_v0  ;;  %v2724_v7 = vld [vmem:[%s3174_s1 + $0x138] sm:$0xff] }
 0x3cd   :  { %v657_v9 = vpop.f32.mrf.mxu0  ;;  %v728_v10 = vpop.f32.mrf.mxu1 }
 0x3ce   :  { %v732_v11 = vadd.f32 %v1465_v8, %v657_v9  ;;  %v749_v3 = vadd.f32 %v2441_v63, %v728_v10  ;;  %v2738_v8 = vld [vmem:[%s3174_s1 + $0x120] sm:$0xff]  ;;  %v2752_v9 = vld [vmem:[%s3174_s1 + $0x108] sm:$0xff]  ;;  %v2766_v10 = vld [vmem:[%s3174_s1 + $0xf0] sm:$0xff] }
 0x3cf   :  { %v1760_v12 = vpop.f32.mrf.mxu1  ;;  %v659_v17 = vpop.f32.mrf.mxu0 }
 0x3d0   :  { %v1466_v13 = vmul.f32 -1.442695, %v732_v11  ;;  %v742_v54 = vadd.f32 %v740_v15, %v659_v17  ;;  %v2780_v11 = vld [vmem:[%s3174_s1 + $0xd8] sm:$0xff]  ;;  %v2861_v12 = vld [vmem:[%s3174_s1 + $0x160] sm:$0xff]  ;;  %v2879_v15 = vld [vmem:[%s3174_s1 + $0x130] sm:$0xff] }
 0x3d1   :  { %v2888_v17 = vld [vmem:[%s3174_s1 + $0x118] sm:$0xff] }
 0x3d2   :  { %1933 = vpow2.f32 %v1466_v13  ;;  %v1467_v40 = vmul.f32 -1.442695, %v742_v54  ;;  %v2870_v13 = vld [vmem:[%s3174_s1 + $0x148] sm:$0xff]  ;;  %v2897_v54 = vld [vmem:[%s3174_s1 + $0x100] sm:$0xff] }
 0x3d4   :  { %1935 = vpow2.f32 %v1467_v40  ;;  %v2906_v40 = vld [vmem:[%s3174_s1 + $0xe8] sm:$0xff] }
 0x3df   :  { %v1934_v41 = vpop.eup %1933 }
 0x3e0   :  { %v736_v43 = vadd.f32 1.0, %v1934_v41  ;;  %v2914_v41 = vld [vmem:[%s3174_s1 + $0xc0] sm:$0xff] }
 0x3e1   :  { %v1936_v48 = vpop.eup %1935 }
 0x3e2   :  { %1937 = vrcp.f32 %v736_v43  ;;  %v746_v49 = vadd.f32 1.0, %v1936_v48  ;;  %v2920_v43 = vld [vmem:[%s3174_s1 + $0xd0] sm:$0xff] }
 0x3e3   :  { %v2926_v48 = vld [vmem:[%s3174_s1 + $0xb0] sm:$0xff] }
 0x3e4   :  { %1939 = vrcp.f32 %v746_v49  ;;  %v2933_v49 = vld [vmem:[%s3174_s1 + $0xa8] sm:$0xff] }
 0x3ef   :  { %v1938_v57 = vpop.eup %1937 }
 0x3f0   :  { %v750_v50 = vmul.f32 %v1938_v57, %v749_v3  ;;  %v2945_v3 = vld [vmem:[%s3174_s1 + $0x98] sm:$0xff]  ;;  %v2952_v57 = vld [vmem:[%s3174_s1 + $0x90] sm:$0xff] }
 0x3f1   :  { %v1940_v51 = vpop.eup %1939 }
 0x3f2   :  { %v753_v62 = vadd.f32 %v751_v61, %v750_v50  ;;  %v755_v52 = vsub.f32 1.0, %v1940_v51  ;;  %v757_v55 = vmul.f32 %v1940_v51, %v2605_v60  ;;  %v2710_v60 = vld [vmem:[%s3174_s1 + $0x150] sm:$0xff]  ;;  %v2939_v61 = vld [vmem:[%s3174_s1 + $0xb8] sm:$0xff]  ;;  %v2958_v50 = vld [vmem:[%s3174_s1 + $0xa0] sm:$0xff] }
 0x3f3   :  { %v2971_v51 = vld [vmem:[%s3174_s1 + $0x78] sm:$0xff] }
 0x3f4   :  { %1941 = vtanh.f32 %v753_v62  ;;  %v2964_v62 = vld [vmem:[%s3174_s1 + $0x80] sm:$0xff] }
 0x401   :  { %v1942_v53 = vpop.eup %1941 }
 0x402   :  { %v756_v44 = vmul.f32 %v1942_v53, %v755_v52  ;;  %v2977_v52 = vld [vmem:[%s3174_s1 + $0x88] sm:$0xff] }
 0x403   :  { %v2983_v53 = vld [vmem:[%s3174_s1 + $0x68] sm:$0xff] }
 0x404   :  { %v2685_v56 = vadd.f32 %v757_v55, %v756_v44  ;;  %v2990_v44 = vld [vmem:[%s3174_s1 + $0x60] sm:$0xff]  ;;  %v2996_v55 = vld [vmem:[%s3174_s1 + $0x70] sm:$0xff] }
 0x406   :  { %1468 = vst [vmem:[%s3177_s3 + $0x6] sm:$0x3] %v2685_v56  ;;  %828 = vmatmul.mubr.f32.vlgmr.msra.gmra.mxu0 %v2685_v56  ;;  %1794 = vmatmul.mubr.f32.vlgmr.msra.gmra.mxu1 %v2685_v56 }
 0x407   :  { %936 = vmatpush1.msra.mxu0 %v2696_v58  ;;  %1797 = vmatpush3.msra.mxu1 %v2137_v14  ;;  %v2717_v14 = vld [vmem:[%s3174_s1 + $0x140] sm:$0xff] }
 0x408   :  { %937 = vmatprep.subr.mxu0 %v2703_v59  ;;  %1798 = vmatprep.subr.mxu1 %v3203_v0 }
 0x409   :  { %938 = vmatpush1.msra.mxu0 %v2710_v60  ;;  %1799 = vmatpush3.msra.mxu1 %v2149_v16  ;;  %v2731_v16 = vld [vmem:[%s3174_s1 + $0x128] sm:$0xff] }
 0x40a   :  { %939 = vmatprep.subr.mxu0 %v2717_v14  ;;  %1800 = vmatprep.subr.mxu1 %v3203_v0 }
 0x40b   :  { %940 = vmatpush1.msra.mxu0 %v2724_v7  ;;  %1801 = vmatpush3.msra.mxu1 %v2161_v18  ;;  %v2745_v18 = vld [vmem:[%s3174_s1 + $0x110] sm:$0xff] }
 0x40c   :  { %941 = vmatprep.subr.mxu0 %v2731_v16  ;;  %1802 = vmatprep.subr.mxu1 %v3203_v0 }
 0x40d   :  { %942 = vmatpush1.msra.mxu0 %v2738_v8  ;;  %1803 = vmatpush3.msra.mxu1 %v2180_v21  ;;  %v2759_v21 = vld [vmem:[%s3174_s1 + $0xf8] sm:$0xff] }
 0x40e   :  { %943 = vmatprep.subr.mxu0 %v2745_v18  ;;  %1804 = vmatprep.subr.mxu1 %v3203_v0 }
 0x40f   :  { %944 = vmatpush1.msra.mxu0 %v2752_v9  ;;  %1805 = vmatpush3.msra.mxu1 %v2199_v24  ;;  %v2773_v24 = vld [vmem:[%s3174_s1 + $0xe0] sm:$0xff] }
 0x410   :  { %945 = vmatprep.subr.mxu0 %v2759_v21  ;;  %1806 = vmatprep.subr.mxu1 %v3203_v0 }
 0x411   :  { %946 = vmatpush1.msra.mxu0 %v2766_v10  ;;  %1807 = vmatpush3.msra.mxu1 %v2218_v27  ;;  %v2787_v27 = vld [vmem:[%s3174_s1 + $0xc8] sm:$0xff] }
 0x412   :  { %947 = vmatprep.subr.mxu0 %v2773_v24  ;;  %1808 = vmatprep.subr.mxu1 %v3203_v0 }
 0x413   :  { %948 = vmatpush1.msra.mxu0 %v2780_v11  ;;  %1809 = vmatpush3.msra.mxu1 %v2237_v30 }
 0x414   :  { %949 = vmatprep.subr.mxu0 %v2787_v27  ;;  %1810 = vmatprep.subr.mxu1 %v3203_v0 }
 0x415   :  { %950 = vmatpush1.msra.mxu0 %v2167_v19  ;;  %1811 = vmatpush3.msra.mxu1 %v2256_v33  ;;  %v2831_v19 = vld [vmem:[%s3174_s1 + $0x170] sm:$0xff] }
 0x416   :  { %951 = vmatprep.subr.mxu0 %v2174_v20  ;;  %1812 = vmatprep.subr.mxu1 %v3203_v0  ;;  %v1469_v20 = vld [vmem:[%s3175_s0 + $0x18] sm:$0x3f] }
 0x417   :  { %952 = vmatpush1.msra.mxu0 %v2186_v22  ;;  %1813 = vmatpush3.msra.mxu1 %v2275_v36 }
 0x418   :  { %953 = vmatprep.subr.mxu0 %v2193_v23  ;;  %1814 = vmatprep.subr.mxu1 %v3203_v0 }
 0x419   :  { %954 = vmatpush1.msra.mxu0 %v2205_v25  ;;  %1815 = vmatpush3.msra.mxu1 %v2294_v39 }
 0x41a   :  { %955 = vmatprep.subr.mxu0 %v2212_v26  ;;  %1816 = vmatprep.subr.mxu1 %v3203_v0 }
 0x41b   :  { %956 = vmatpush1.msra.mxu0 %v2224_v28  ;;  %1817 = vmatpush3.msra.mxu1 %v2313_v42 }
 0x41c   :  { %957 = vmatprep.subr.mxu0 %v2231_v29  ;;  %1818 = vmatprep.subr.mxu1 %v3203_v0  ;;  %v912_v29 = vrot.slane %v1469_v20, 2 }
 0x41d   :  { %958 = vmatpush1.msra.mxu0 %v2243_v31  ;;  %1819 = vmatpush3.msra.mxu1 %v2329_v45 }
 0x41e   :  { %959 = vmatprep.subr.mxu0 %v2250_v32  ;;  %1820 = vmatprep.subr.mxu1 %v3203_v0 }
 0x41f   :  { %960 = vmatpush1.msra.mxu0 %v2262_v34  ;;  %1821 = vmatpush3.msra.mxu1 %v2338_v46 }
 0x420   :  { %961 = vmatprep.subr.mxu0 %v2269_v35  ;;  %1822 = vmatprep.subr.mxu1 %v3203_v0 }
 0x421   :  { %962 = vmatpush1.msra.mxu0 %v2281_v37  ;;  %1823 = vmatpush3.msra.mxu1 %v2346_v47  ;;  %v923_v37 = vrot.slane %v1469_v20, 4 }
 0x422   :  { %963 = vmatprep.subr.mxu0 %v2288_v38  ;;  %1824 = vmatprep.subr.mxu1 %v3203_v0 }
 0x423   :  { %964 = vmatpush1.msra.mxu0 %v3211_v1  ;;  %1825 = vmatpush3.msra.mxu1 %v3212_v2 }
 0x424   :  { %965 = vmatprep.subr.mxu0 %v3213_v4  ;;  %1826 = vmatprep.subr.mxu1 %v3203_v0 }
 0x425   :  { %966 = vmatpush1.msra.mxu0 %v3214_v5  ;;  %999 = vmatprep.mubr.f32.mxu0 %v3203_v0 }
 0x426   :  { %1827 = vmatpush3.msra.mxu1 %v3215_v6  ;;  %1828 = vmatprep.mubr.msk.f32.mxu1 %vm2033_vm0, %v3203_v0  ;;  %v2852_v6 = vld [vmem:[%s3174_s1 + $0x178] sm:$0xff] }
 0x427   :  { %1107 = vmatprep.subr.mxu0 %v2831_v19  ;;  %1831 = vmatprep.subr.mxu1 %v3203_v0 }
 0x4c6   :  { %v829_v22 = vpop.f32.mrf.mxu0  ;;  %v900_v23 = vpop.f32.mrf.mxu1 }
 0x4c7   :  { %v904_v25 = vadd.f32 %v1469_v20, %v829_v22  ;;  %v921_v38 = vadd.f32 %v2441_v63, %v900_v23  ;;  %v3009_v20 = vld [vmem:[%s3174_s1 + $0x48] sm:$0xff]  ;;  %v3015_v22 = vld [vmem:[%s3174_s1 + $0x58] sm:$0xff] }
 0x4c8   :  { %v1795_v26 = vpop.f32.mrf.mxu1  ;;  %v831_v30 = vpop.f32.mrf.mxu0  ;;  %v3021_v23 = vld [vmem:[%s3174_s1 + $0x38] sm:$0xff] }
 0x4c9   :  { %v1470_v28 = vmul.f32 -1.442695, %v904_v25  ;;  %v914_v31 = vadd.f32 %v912_v29, %v831_v30  ;;  %v3028_v25 = vld [vmem:[%s3174_s1 + $0x30] sm:$0xff]  ;;  %v3034_v26 = vld [vmem:[%s3174_s1 + $0x40] sm:$0xff]  ;;  %v3047_v29 = vld [vmem:[%s3174_s1 + $0x18] sm:$0xff] }
 0x4ca   :  { %3217 = vst [vmem:[#allocation4_spill] sm:$0xff] %v3047_v29  ;;  %v3053_v30 = vld [vmem:[%s3174_s1 + $0x28] sm:$0xff] }
 0x4cb   :  { %1943 = vpow2.f32 %v1470_v28  ;;  %v1471_v32 = vmul.f32 -1.442695, %v914_v31  ;;  %v3040_v28 = vld [vmem:[%s3174_s1 + $0x20] sm:$0xff]  ;;  %3218 = vst [vmem:[#allocation7_spill] sm:$0xff] %v3053_v30  ;;  %v3059_v31 = vld [vmem:[%s3174_s1 + $0x8] sm:$0xff] }
 0x4cc   :  { %3219 = vst [vmem:[#allocation5_spill] sm:$0xff] %v3059_v31 }
 0x4cd   :  { %1945 = vpow2.f32 %v1471_v32  ;;  %v3066_v32 = vld [vmem:[%s3174_s1] sm:$0xff] }
 0x4ce   :  { %3220 = vst [vmem:[#allocation6_spill] sm:$0xff] %v3066_v32 }
 0x4d8   :  { %v1944_v33 = vpop.eup %1943 }
 0x4d9   :  { %v908_v34 = vadd.f32 1.0, %v1944_v33  ;;  %v3073_v33 = vld [vmem:[%s3174_s1 + $0x10] sm:$0xff] }
 0x4da   :  { %v1946_v35 = vpop.eup %1945  ;;  %3221 = vst [vmem:[#allocation8_spill] sm:$0xff] %v3073_v33 }
 0x4db   :  { %1947 = vrcp.f32 %v908_v34  ;;  %v918_v36 = vadd.f32 1.0, %v1946_v35  ;;  %v1473_v34 = vld [vmem:[%s3175_s0 + $0x1e] sm:$0x3f] }
 0x4dd   :  { %1949 = vrcp.f32 %v918_v36 }
 0x4e8   :  { %v1948_v39 = vpop.eup %1947 }
 0x4e9   :  { %v922_v42 = vmul.f32 %v1948_v39, %v921_v38 }
 0x4ea   :  { %v1950_v46 = vpop.eup %1949 }
 0x4eb   :  { %v925_v45 = vadd.f32 %v923_v37, %v922_v42  ;;  %v927_v47 = vsub.f32 1.0, %v1950_v46  ;;  %v929_v4 = vmul.f32 %v1950_v46, %v2685_v56  ;;  %v3002_v56 = vld [vmem:[%s3174_s1 + $0x50] sm:$0xff]  ;;  %v1084_v42 = vrot.slane %v1473_v34, 2 }
 0x4ed   :  { %1951 = vtanh.f32 %v925_v45 }
 0x4fa   :  { %v1952_v1 = vpop.eup %1951 }
 0x4fb   :  { %v928_v2 = vmul.f32 %v1952_v1, %v927_v47 }
 0x4fd   :  { %v2840_v5 = vadd.f32 %v929_v4, %v928_v2 }
 0x4ff   :  { %1472 = vst [vmem:[%s3177_s3 + $0x8] sm:$0x3] %v2840_v5  ;;  %1000 = vmatmul.mubr.f32.vlgmr.msra.gmra.mxu0 %v2840_v5  ;;  %1829 = vmatmul.mubr.f32.vlgmr.msra.gmra.mxu1 %v2840_v5 }
 0x500   :  { %1108 = vmatpush1.msra.mxu0 %v2696_v58  ;;  %1832 = vmatpush3.msra.mxu1 %v2852_v6 }
 0x501   :  { %1109 = vmatprep.subr.mxu0 %v2703_v59  ;;  %1833 = vmatprep.subr.mxu1 %v3203_v0 }
 0x502   :  { %1110 = vmatpush1.msra.mxu0 %v2710_v60  ;;  %1834 = vmatpush3.msra.mxu1 %v2861_v12 }
 0x503   :  { %1111 = vmatprep.subr.mxu0 %v2717_v14  ;;  %1835 = vmatprep.subr.mxu1 %v3203_v0 }
 0x504   :  { %1112 = vmatpush1.msra.mxu0 %v2724_v7  ;;  %1836 = vmatpush3.msra.mxu1 %v2870_v13 }
 0x505   :  { %1113 = vmatprep.subr.mxu0 %v2731_v16  ;;  %1837 = vmatprep.subr.mxu1 %v3203_v0 }
 0x506   :  { %1114 = vmatpush1.msra.mxu0 %v2738_v8  ;;  %1838 = vmatpush3.msra.mxu1 %v2879_v15 }
 0x507   :  { %1115 = vmatprep.subr.mxu0 %v2745_v18  ;;  %1839 = vmatprep.subr.mxu1 %v3203_v0 }
 0x508   :  { %1116 = vmatpush1.msra.mxu0 %v2752_v9  ;;  %1840 = vmatpush3.msra.mxu1 %v2888_v17 }
 0x509   :  { %1117 = vmatprep.subr.mxu0 %v2759_v21  ;;  %1841 = vmatprep.subr.mxu1 %v3203_v0 }
 0x50a   :  { %1118 = vmatpush1.msra.mxu0 %v2766_v10  ;;  %1842 = vmatpush3.msra.mxu1 %v2897_v54 }
 0x50b   :  { %1119 = vmatprep.subr.mxu0 %v2773_v24  ;;  %1843 = vmatprep.subr.mxu1 %v3203_v0 }
 0x50c   :  { %1120 = vmatpush1.msra.mxu0 %v2780_v11  ;;  %1844 = vmatpush3.msra.mxu1 %v2906_v40 }
 0x50d   :  { %1121 = vmatprep.subr.mxu0 %v2787_v27  ;;  %1845 = vmatprep.subr.mxu1 %v3203_v0 }
 0x50e   :  { %1122 = vmatpush1.msra.mxu0 %v2914_v41  ;;  %1846 = vmatpush3.msra.mxu1 %v2920_v43 }
 0x50f   :  { %1123 = vmatprep.subr.mxu0 %v2926_v48  ;;  %1847 = vmatprep.subr.mxu1 %v3203_v0 }
 0x510   :  { %1124 = vmatpush1.msra.mxu0 %v2933_v49  ;;  %1848 = vmatpush3.msra.mxu1 %v2939_v61 }
 0x511   :  { %1125 = vmatprep.subr.mxu0 %v2945_v3  ;;  %1849 = vmatprep.subr.mxu1 %v3203_v0 }
 0x512   :  { %1126 = vmatpush1.msra.mxu0 %v2952_v57  ;;  %1850 = vmatpush3.msra.mxu1 %v2958_v50 }
 0x513   :  { %1127 = vmatprep.subr.mxu0 %v2964_v62  ;;  %1851 = vmatprep.subr.mxu1 %v3203_v0 }
 0x514   :  { %1128 = vmatpush1.msra.mxu0 %v2971_v51  ;;  %1852 = vmatpush3.msra.mxu1 %v2977_v52 }
 0x515   :  { %1129 = vmatprep.subr.mxu0 %v2983_v53  ;;  %1853 = vmatprep.subr.mxu1 %v3203_v0 }
 0x516   :  { %1130 = vmatpush1.msra.mxu0 %v2990_v44  ;;  %1854 = vmatpush3.msra.mxu1 %v2996_v55 }
 0x517   :  { %1131 = vmatprep.subr.mxu0 %v3002_v56  ;;  %1855 = vmatprep.subr.mxu1 %v3203_v0 }
 0x518   :  { %1132 = vmatpush1.msra.mxu0 %v3009_v20  ;;  %1856 = vmatpush3.msra.mxu1 %v3015_v22 }
 0x519   :  { %1133 = vmatprep.subr.mxu0 %v3021_v23  ;;  %1857 = vmatprep.subr.mxu1 %v3203_v0 }
 0x51a   :  { %1134 = vmatpush1.msra.mxu0 %v3028_v25  ;;  %1858 = vmatpush3.msra.mxu1 %v3034_v26 }
 0x51b   :  { %1135 = vmatprep.subr.mxu0 %v3040_v28  ;;  %1859 = vmatprep.subr.mxu1 %v3203_v0 }
 0x51c   :  { %1136 = vmatpush1.msra.mxu0 %v3047_v29  ;;  %1860 = vmatpush3.msra.mxu1 %v3053_v30 }
 0x51d   :  { %1137 = vmatprep.subr.mxu0 %v3059_v31  ;;  %1861 = vmatprep.subr.mxu1 %v3203_v0 }
 0x51e   :  { %1138 = vmatpush1.msra.mxu0 %v3066_v32  ;;  %1171 = vmatprep.mubr.f32.mxu0 %v3203_v0 }
 0x51f   :  { %1862 = vmatpush3.msra.mxu1 %v3073_v33  ;;  %1863 = vmatprep.mubr.msk.f32.mxu1 %vm2033_vm0, %v3203_v0  ;;  %v1095_v33 = vrot.slane %v1473_v34, 4 }
 0x520   :  { %1279 = vmatprep.subr.mxu0 %v2831_v19  ;;  %1866 = vmatprep.subr.mxu1 %v3203_v0 }
 0x5bf   :  { %v1001_v35 = vpop.f32.mrf.mxu0  ;;  %v1072_v36 = vpop.f32.mrf.mxu1 }
 0x5c0   :  { %v1076_v37 = vadd.f32 %v1473_v34, %v1001_v35  ;;  %v1093_v32 = vadd.f32 %v2441_v63, %v1072_v36  ;;  %v3222_v63 = vld [vmem:[#allocation4_spill] sm:$0xff] }
 0x5c1   :  { %v1830_v38 = vpop.f32.mrf.mxu1  ;;  %v1003_v45 = vpop.f32.mrf.mxu0 }
 0x5c2   :  { %v1474_v39 = vmul.f32 -1.442695, %v1076_v37  ;;  %v1086_v46 = vadd.f32 %v1084_v42, %v1003_v45 }
 0x5c4   :  { %1953 = vpow2.f32 %v1474_v39  ;;  %v1475_v47 = vmul.f32 -1.442695, %v1086_v46 }
 0x5c6   :  { %1955 = vpow2.f32 %v1475_v47 }
 0x5d1   :  { %v1954_v1 = vpop.eup %1953 }
 0x5d2   :  { %v1080_v2 = vadd.f32 1.0, %v1954_v1 }
 0x5d3   :  { %v1956_v19 = vpop.eup %1955 }
 0x5d4   :  { %1957 = vrcp.f32 %v1080_v2  ;;  %v1090_v4 = vadd.f32 1.0, %v1956_v19 }
 0x5d6   :  { %1959 = vrcp.f32 %v1090_v4 }
 0x5e1   :  { %v1958_v31 = vpop.eup %1957 }
 0x5e2   :  { %v1094_v30 = vmul.f32 %v1958_v31, %v1093_v32 }
 0x5e3   :  { %v1960_v37 = vpop.eup %1959 }
 0x5e4   :  { %v1097_v35 = vadd.f32 %v1095_v33, %v1094_v30  ;;  %v1099_v38 = vsub.f32 1.0, %v1960_v37  ;;  %v1101_v42 = vmul.f32 %v1960_v37, %v2840_v5 }
 0x5e6   :  { %1961 = vtanh.f32 %v1097_v35 }
 0x5f3   :  { %v1962_v29 = vpop.eup %1961 }
 0x5f4   :  { %v1100_v39 = vmul.f32 %v1962_v29, %v1099_v38 }
 0x5f6   :  { %v3085_v45 = vadd.f32 %v1101_v42, %v1100_v39 }
 0x5f8   :  { %1476 = vst [vmem:[%s3177_s3 + $0xa] sm:$0x3] %v3085_v45  ;;  %1172 = vmatmul.mubr.f32.vlgmr.msra.gmra.mxu0 %v3085_v45  ;;  %1864 = vmatmul.mubr.f32.vlgmr.msra.gmra.mxu1 %v3085_v45 }
 0x5f9   :  { %1280 = vmatpush1.msra.mxu0 %v2696_v58  ;;  %1867 = vmatpush3.msra.mxu1 %v2852_v6  ;;  %v3223_v58 = vld [vmem:[#allocation7_spill] sm:$0xff] }
 0x5fa   :  { %1281 = vmatprep.subr.mxu0 %v2703_v59  ;;  %1868 = vmatprep.subr.mxu1 %v3203_v0  ;;  %v3224_v59 = vld [vmem:[#allocation5_spill] sm:$0xff] }
 0x5fb   :  { %1282 = vmatpush1.msra.mxu0 %v2710_v60  ;;  %1869 = vmatpush3.msra.mxu1 %v2861_v12  ;;  %v3225_v60 = vld [vmem:[#allocation6_spill] sm:$0xff] }
 0x5fc   :  { %1283 = vmatprep.subr.mxu0 %v2717_v14  ;;  %1870 = vmatprep.subr.mxu1 %v3203_v0  ;;  %v3226_v14 = vld [vmem:[#allocation8_spill] sm:$0xff] }
 0x5fd   :  { %1284 = vmatpush1.msra.mxu0 %v2724_v7  ;;  %1871 = vmatpush3.msra.mxu1 %v2870_v13  ;;  %v1477_v7 = vld [vmem:[%s3175_s0 + $0x24] sm:$0x3f] }
 0x5fe   :  { %1285 = vmatprep.subr.mxu0 %v2731_v16  ;;  %1872 = vmatprep.subr.mxu1 %v3203_v0  ;;  %v1267_v13 = vrot.slane %v1477_v7, 4 }
 0x5ff   :  { %1286 = vmatpush1.msra.mxu0 %v2738_v8  ;;  %1873 = vmatpush3.msra.mxu1 %v2879_v15  ;;  %v2031_v15 = vld [vmem:[%s3176_s2] ss:$0 sm:$0xff] }
 0x600   :  { %1287 = vmatprep.subr.mxu0 %v2745_v18  ;;  %1874 = vmatprep.subr.mxu1 %v3203_v0 }
 0x601   :  { %1288 = vmatpush1.msra.mxu0 %v2752_v9  ;;  %1875 = vmatpush3.msra.mxu1 %v2888_v17 }
 0x602   :  { %1289 = vmatprep.subr.mxu0 %v2759_v21  ;;  %1876 = vmatprep.subr.mxu1 %v3203_v0 }
 0x603   :  { %1290 = vmatpush1.msra.mxu0 %v2766_v10  ;;  %1877 = vmatpush3.msra.mxu1 %v2897_v54  ;;  %v1256_v10 = vrot.slane %v1477_v7, 2 }
 0x604   :  { %1291 = vmatprep.subr.mxu0 %v2773_v24  ;;  %1878 = vmatprep.subr.mxu1 %v3203_v0 }
 0x605   :  { %1292 = vmatpush1.msra.mxu0 %v2780_v11  ;;  %1879 = vmatpush3.msra.mxu1 %v2906_v40 }
 0x606   :  { %1293 = vmatprep.subr.mxu0 %v2787_v27  ;;  %1880 = vmatprep.subr.mxu1 %v3203_v0 }
 0x607   :  { %1294 = vmatpush1.msra.mxu0 %v2914_v41  ;;  %1881 = vmatpush3.msra.mxu1 %v2920_v43 }
 0x608   :  { %1295 = vmatprep.subr.mxu0 %v2926_v48  ;;  %1882 = vmatprep.subr.mxu1 %v3203_v0 }
 0x609   :  { %1296 = vmatpush1.msra.mxu0 %v2933_v49  ;;  %1883 = vmatpush3.msra.mxu1 %v2939_v61 }
 0x60a   :  { %1297 = vmatprep.subr.mxu0 %v2945_v3  ;;  %1884 = vmatprep.subr.mxu1 %v3203_v0 }
 0x60b   :  { %1298 = vmatpush1.msra.mxu0 %v2952_v57  ;;  %1885 = vmatpush3.msra.mxu1 %v2958_v50  ;;  %v1481_v50 = vld [vmem:[%s3175_s0 + $0x2a] sm:$0x3f] }
 0x60c   :  { %1299 = vmatprep.subr.mxu0 %v2964_v62  ;;  %1886 = vmatprep.subr.mxu1 %v3203_v0  ;;  %v1439_v29 = vrot.slane %v1481_v50, 4 }
 0x60d   :  { %1300 = vmatpush1.msra.mxu0 %v2971_v51  ;;  %1887 = vmatpush3.msra.mxu1 %v2977_v52 }
 0x60e   :  { %1301 = vmatprep.subr.mxu0 %v2983_v53  ;;  %1888 = vmatprep.subr.mxu1 %v3203_v0 }
 0x60f   :  { %1302 = vmatpush1.msra.mxu0 %v2990_v44  ;;  %1889 = vmatpush3.msra.mxu1 %v2996_v55  ;;  %v1428_v55 = vrot.slane %v1481_v50, 2 }
 0x610   :  { %1303 = vmatprep.subr.mxu0 %v3002_v56  ;;  %1890 = vmatprep.subr.mxu1 %v3203_v0 }
 0x611   :  { %1304 = vmatpush1.msra.mxu0 %v3009_v20  ;;  %1891 = vmatpush3.msra.mxu1 %v3015_v22 }
 0x612   :  { %1305 = vmatprep.subr.mxu0 %v3021_v23  ;;  %1892 = vmatprep.subr.mxu1 %v3203_v0 }
 0x613   :  { %1306 = vmatpush1.msra.mxu0 %v3028_v25  ;;  %1893 = vmatpush3.msra.mxu1 %v3034_v26 }
 0x614   :  { %1307 = vmatprep.subr.mxu0 %v3040_v28  ;;  %1894 = vmatprep.subr.mxu1 %v3203_v0 }
 0x615   :  { %1308 = vmatpush1.msra.mxu0 %v3222_v63  ;;  %1895 = vmatpush3.msra.mxu1 %v3223_v58 }
 0x616   :  { %1309 = vmatprep.subr.mxu0 %v3224_v59  ;;  %1896 = vmatprep.subr.mxu1 %v3203_v0 }
 0x617   :  { %1310 = vmatpush1.msra.mxu0 %v3225_v60  ;;  %1343 = vmatprep.mubr.f32.mxu0 %v3203_v0 }
 0x618   :  { %1897 = vmatpush3.msra.mxu1 %v3226_v14  ;;  %1898 = vmatprep.mubr.msk.f32.mxu1 %vm2033_vm0, %v3203_v0 }
 0x6b8   :  { %v1173_v16 = vpop.f32.mrf.mxu0  ;;  %v1244_v8 = vpop.f32.mrf.mxu1 }
 0x6b9   :  { %v1248_v18 = vadd.f32 %v1477_v7, %v1173_v16  ;;  %v1265_v17 = vadd.f32 %v2031_v15, %v1244_v8 }
 0x6ba   :  { %v1865_v9 = vpop.f32.mrf.mxu1  ;;  %v1175_v24 = vpop.f32.mrf.mxu0 }
 0x6bb   :  { %v1478_v21 = vmul.f32 -1.442695, %v1248_v18  ;;  %v1258_v11 = vadd.f32 %v1256_v10, %v1175_v24 }
 0x6bd   :  { %1963 = vpow2.f32 %v1478_v21  ;;  %v1479_v27 = vmul.f32 -1.442695, %v1258_v11 }
 0x6bf   :  { %1965 = vpow2.f32 %v1479_v27 }
 0x6ca   :  { %v1964_v5 = vpop.eup %1963 }
 0x6cb   :  { %v1252_v6 = vadd.f32 1.0, %v1964_v5 }
 0x6cc   :  { %v1966_v12 = vpop.eup %1965 }
 0x6cd   :  { %1967 = vrcp.f32 %v1252_v6  ;;  %v1262_v0 = vadd.f32 1.0, %v1966_v12 }
 0x6cf   :  { %1969 = vrcp.f32 %v1262_v0 }
 0x6da   :  { %v1968_v54 = vpop.eup %1967 }
 0x6db   :  { %v1266_v40 = vmul.f32 %v1968_v54, %v1265_v17 }
 0x6dc   :  { %v1970_v43 = vpop.eup %1969 }
 0x6dd   :  { %v1269_v41 = vadd.f32 %v1267_v13, %v1266_v40  ;;  %v1271_v48 = vsub.f32 1.0, %v1970_v43  ;;  %v1273_v3 = vmul.f32 %v1970_v43, %v3085_v45 }
 0x6df   :  { %1971 = vtanh.f32 %v1269_v41 }
 0x6ec   :  { %v1972_v49 = vpop.eup %1971 }
 0x6ed   :  { %v1272_v61 = vmul.f32 %v1972_v49, %v1271_v48 }
 0x6ef   :  { %v1274_v57 = vadd.f32 %v1273_v3, %v1272_v61 }
 0x6f1   :  { %1480 = vst [vmem:[%s3177_s3 + $0xc] sm:$0x3] %v1274_v57  ;;  %1344 = vmatmul.mubr.f32.vlgmr.msra.gmra.mxu0 %v1274_v57  ;;  %1899 = vmatmul.mubr.f32.vlgmr.msra.gmra.mxu1 %v1274_v57 }
 0x7b1   :  { %v1345_v62 = vpop.f32.mrf.mxu0  ;;  %v1416_v51 = vpop.f32.mrf.mxu1 }
 0x7b2   :  { %v1420_v52 = vadd.f32 %v1481_v50, %v1345_v62  ;;  %v1437_v30 = vadd.f32 %v2031_v15, %v1416_v51 }
 0x7b3   :  { %v1900_v53 = vpop.f32.mrf.mxu1  ;;  %v1347_v56 = vpop.f32.mrf.mxu0 }
 0x7b4   :  { %v1482_v44 = vmul.f32 -1.442695, %v1420_v52  ;;  %v1430_v20 = vadd.f32 %v1428_v55, %v1347_v56 }
 0x7b6   :  { %1973 = vpow2.f32 %v1482_v44  ;;  %v1483_v22 = vmul.f32 -1.442695, %v1430_v20 }
 0x7b8   :  { %1975 = vpow2.f32 %v1483_v22 }
 0x7c3   :  { %v1974_v23 = vpop.eup %1973 }
 0x7c4   :  { %v1424_v25 = vadd.f32 1.0, %v1974_v23 }
 0x7c5   :  { %v1976_v26 = vpop.eup %1975 }
 0x7c6   :  { %1977 = vrcp.f32 %v1424_v25  ;;  %v1434_v28 = vadd.f32 1.0, %v1976_v26 }
 0x7c8   :  { %1979 = vrcp.f32 %v1434_v28 }
 0x7d3   :  { %v1978_v31 = vpop.eup %1977 }
 0x7d4   :  { %v1438_v32 = vmul.f32 %v1978_v31, %v1437_v30 }
 0x7d5   :  { %v1980_v34 = vpop.eup %1979 }
 0x7d6   :  { %v1441_v33 = vadd.f32 %v1439_v29, %v1438_v32  ;;  %v1443_v36 = vsub.f32 1.0, %v1980_v34  ;;  %v1445_v1 = vmul.f32 %v1980_v34, %v1274_v57 }
 0x7d8   :  { %1981 = vtanh.f32 %v1441_v33 }
 0x7e5   :  { %v1982_v46 = vpop.eup %1981 }
 0x7e6   :  { %v1444_v47 = vmul.f32 %v1982_v46, %v1443_v36 }
 0x7e8   :  { %v1446_v2 = vadd.f32 %v1445_v1, %v1444_v47 }
 0x7ea   :  { %1484 = vst [vmem:[%s3177_s3 + $0xe] sm:$0x3] %v1446_v2  ;;  %1449 = vst [vmem:[#allocation2] sm:$0x3] %v1446_v2 }

</bundles_post_ra>
